<compile_context>
chip_gen: v6e
topology: v6e:2x2x1
jax: 0.10.0
libtpu: 0.0.40
codegen_flags: <defaults>
</compile_context>

<pallas_src>
import functools

import jax
import jax.numpy as jnp
from jax.experimental import pallas as pl
from jax.experimental.pallas import tpu as pltpu


# ---------------------------------------------------------------------------
# value-level helpers (operate on values inside the kernel)
# ---------------------------------------------------------------------------
def _fshift_m1(x):
    """u[:, f] = x[:, f+1], u[:, F-1] = 0   (x: (T, F, C))."""
    return jnp.concatenate([x[:, 1:], jnp.zeros_like(x[:, :1])], axis=1)


def _fshift_p1(x):
    """u[:, f] = x[:, f-1], u[:, 0] = 0."""
    return jnp.concatenate([jnp.zeros_like(x[:, :1]), x[:, :-1]], axis=1)


def _split_matmul(a, b, w):
    """(T,F,Ca) @ w[:Ca] + (T,F,Cb) @ w[Ca:]  ->  (T, F, N) f32.

    Replaces the channel skip-concat: the conv-transpose weight rows are split
    between the encoder-skip part and the previous-layer part and both feed one
    f32 accumulator.  The weight already has all Kt*Kf taps fused along its
    output dim, so this is one wide MXU matmul per operand (not one per tap).
    """
    t, f, ca = a.shape
    cb = b.shape[-1]
    za = jnp.dot(a.reshape(t * f, ca), w[:ca], preferred_element_type=jnp.float32)
    zb = jnp.dot(b.reshape(t * f, cb), w[ca:], preferred_element_type=jnp.float32)
    return (za + zb).reshape(t, f, w.shape[-1])


def _combine_time(z, carry_ref):
    """Fold the two time taps: zc = z[kt=0] + shift_t(z[kt=1]) using the carried
    last row from the previous time tile (zero on tile 0).  Updates the carry
    scratch with this tile's last kt=1 row for the next tile."""
    n = z.shape[-1] // 2
    z0 = z[..., :n]
    z1 = z[..., n:]
    prev = carry_ref[...]                                   # (F, n)
    zc = z0 + jnp.concatenate([prev[None], z1[:-1]], axis=0)
    carry_ref[...] = z1[-1]
    return zc


def _bn_prelu(y, scale, shift, alpha):
    y = y * scale + shift
    return jnp.where(y >= 0.0, y, alpha * y)


def _layer_s1(enc, x, w_ref, carry_ref, scale, shift, alpha):
    """ConvTranspose2d k=(2,3), s=(1,1) + crop[:-1, 1:-1] + folded BN + PReLU."""
    cout = w_ref.shape[-1] // 6
    zc = _combine_time(_split_matmul(enc, x, w_ref[...]), carry_ref)
    y = (_fshift_m1(zc[..., :cout])
         + zc[..., cout:2 * cout]
         + _fshift_p1(zc[..., 2 * cout:3 * cout]))
    return _bn_prelu(y, scale, shift, alpha).astype(jnp.bfloat16)


def _layer_s2k3(enc, x, w_ref, carry_ref, scale, shift, alpha):
    """ConvTranspose2d k=(2,3), s=(1,2) + crop[:-1, :-1] + BN + PReLU.
    Returns even/odd frequency phase planes, each (T, F, Cout)."""
    cout = w_ref.shape[-1] // 6
    zc = _combine_time(_split_matmul(enc, x, w_ref[...]), carry_ref)
    y_e = zc[..., :cout] + _fshift_p1(zc[..., 2 * cout:3 * cout])
    y_o = zc[..., cout:2 * cout]
    y_e = _bn_prelu(y_e, scale, shift, alpha).astype(jnp.bfloat16)
    y_o = _bn_prelu(y_o, scale, shift, alpha).astype(jnp.bfloat16)
    return y_e, y_o


def _layer_s2k5(enc_e, x_e, enc_o, x_o, w_ref, ce_ref, co_ref, bias4):
    """ConvTranspose2d k=(2,5), s=(1,2) + crop[:-1, 1:-1] (conv bias only).

    Inputs are even/odd frequency planes; outputs the four frequency phases of
    y packed lane-dense along channels plus the single last frequency bin:
      packed[:, n, p*C:(p+1)*C] = y[:, 4n+p],   last[:, 0, :] = y[:, 4F].
    """
    cout = w_ref.shape[-1] // 10
    w = w_ref[...]
    zec = _combine_time(_split_matmul(enc_e, x_e, w), ce_ref)   # (T, F, 5*C)
    zoc = _combine_time(_split_matmul(enc_o, x_o, w), co_ref)

    def sl(z, j):
        return z[..., j * cout:(j + 1) * cout]

    p0 = sl(zec, 1) + _fshift_p1(sl(zoc, 3))
    p1 = sl(zoc, 0) + sl(zec, 2) + _fshift_p1(sl(zoc, 4))
    p2 = sl(zoc, 1) + sl(zec, 3)
    p3 = _fshift_m1(sl(zec, 0)) + sl(zoc, 2) + sl(zec, 4)
    packed = jnp.concatenate([p0, p1, p2, p3], axis=-1) + bias4
    last = sl(zoc, 3)[:, -1:, :] + bias4[..., :cout]
    return packed, last


# ---------------------------------------------------------------------------
# fused decoder kernel: grid = (batch [parallel], time-tile [arbitrary])
# ---------------------------------------------------------------------------
def decoder_kernel(d_ref, e4_ref, e3_ref, sm_ref,
                   w1_ref, s1_ref, t1_ref, a1_ref,
                   w2_ref, s2_ref, t2_ref, a2_ref,
                   w3_ref, s3_ref, t3_ref, a3_ref,
                   w4_ref, s4_ref, t4_ref, a4_ref,
                   w5_ref, b5_ref,
                   out_ref, last_ref,
                   c1_ref, c2_ref, c3_ref, c4_ref, c5e_ref, c5o_ref):
    # Zero the per-layer time carries at the start of each batch element.
    @pl.when(pl.program_id(1) == 0)
    def _():
        c1_ref[...] = jnp.zeros_like(c1_ref)
        c2_ref[...] = jnp.zeros_like(c2_ref)
        c3_ref[...] = jnp.zeros_like(c3_ref)
        c4_ref[...] = jnp.zeros_like(c4_ref)
        c5e_ref[...] = jnp.zeros_like(c5e_ref)
        c5o_ref[...] = jnp.zeros_like(c5o_ref)

    d = d_ref[0]                       # (Tt, F, 128)  dprnn_out
    e4 = e4_ref[0]                     # (Tt, F, 128)  encoder_out[4]
    e3 = e3_ref[0]                     # (Tt, F, 64)   encoder_out[3]
    sm = sm_ref[0]                     # (Tt, F, 128)  [e2 | e1 | e0_even | e0_odd]
    enc2 = sm[..., 0:32]
    enc1 = sm[..., 32:64]
    e0e = sm[..., 64:96]
    e0o = sm[..., 96:128]

    x1 = _layer_s1(e4, d, w1_ref, c1_ref, s1_ref[...], t1_ref[...], a1_ref[...])
    x2 = _layer_s1(e3, x1, w2_ref, c2_ref, s2_ref[...], t2_ref[...], a2_ref[...])
    x3 = _layer_s1(enc2, x2, w3_ref, c3_ref, s3_ref[...], t3_ref[...], a3_ref[...])
    x4e, x4o = _layer_s2k3(enc1, x3, w4_ref, c4_ref,
                           s4_ref[...], t4_ref[...], a4_ref[...])
    packed, last = _layer_s2k5(e0e, x4e, e0o, x4o, w5_ref,
                               c5e_ref, c5o_ref, b5_ref[...])
    out_ref[0] = packed
    last_ref[0] = last


# ---------------------------------------------------------------------------
# wrapper
# ---------------------------------------------------------------------------
def decoder_forward(dprnn_out, encoder_out, params, t_tile=None):
    """dprnn_out: (B, 128, T, F) NCHW.
    encoder_out: [e0 (B,32,T,2F), e1 (B,32,T,F), e2 (B,32,T,F),
                  e3 (B,64,T,F),  e4 (B,128,T,F)].
    Returns (B, out_channel, T, 4F+1) NCHW, matching Decoder.forward."""
    B, _, T, F = dprnn_out.shape
    C5 = params["b5p"].shape[-1] // 4

    if t_tile is None:
        t_tile = 1
        for cand in range(min(T, 32), 0, -1):
            if T % cand == 0:
                t_tile = cand
                break
    assert T % t_tile == 0
    nt = T // t_tile

    def nhwc(x):
        return jnp.transpose(x, (0, 2, 3, 1)).astype(jnp.bfloat16)

    d = nhwc(dprnn_out)
    e0, e1, e2, e3, e4 = [nhwc(e) for e in encoder_out]
    # pack the four 32-channel streams into one lane-dense 128-channel input
    small = jnp.concatenate(
        [e2, e1, e0[:, :, 0::2, :], e0[:, :, 1::2, :]], axis=-1)   # (B,T,F,128)

    data = [d, e4, e3, small]
    pnames = ("w1", "s1", "t1", "a1", "w2", "s2", "t2", "a2",
              "w3", "s3", "t3", "a3", "w4", "s4", "t4", "a4", "w5", "b5p")
    plist = [params[k] for k in pnames]

    def data_spec(x):
        c = x.shape[-1]
        return pl.BlockSpec((1, t_tile, F, c), lambda b, t: (b, t, 0, 0))

    def full_spec(p):
        return pl.BlockSpec(p.shape, lambda b, t: (0, 0))

    in_specs = [data_spec(x) for x in data] + [full_spec(p) for p in plist]

    out_shapes = (jax.ShapeDtypeStruct((B, T, F, 4 * C5), jnp.float32),
                  jax.ShapeDtypeStruct((B, T, 1, C5), jnp.float32))
    out_specs = (pl.BlockSpec((1, t_tile, F, 4 * C5), lambda b, t: (b, t, 0, 0)),
                 pl.BlockSpec((1, t_tile, 1, C5), lambda b, t: (b, t, 0, 0)))

    scratch = [
        pltpu.VMEM((F, 3 * 64), jnp.float32),    # layer-1 time carry
        pltpu.VMEM((F, 3 * 32), jnp.float32),    # layer-2
        pltpu.VMEM((F, 3 * 32), jnp.float32),    # layer-3
        pltpu.VMEM((F, 3 * 32), jnp.float32),    # layer-4
        pltpu.VMEM((F, 5 * C5), jnp.float32),    # layer-5 (even plane)
        pltpu.VMEM((F, 5 * C5), jnp.float32),    # layer-5 (odd plane)
    ]

    packed, last = pl.pallas_call(
        decoder_kernel,
        out_shape=out_shapes,
        grid=(B, nt),
        in_specs=in_specs,
        out_specs=out_specs,
        scratch_shapes=scratch,
        compiler_params=pltpu.CompilerParams(
            dimension_semantics=("parallel", "arbitrary"),
            vmem_limit_bytes=48 * 1024 * 1024),
    )(*data, *plist)

    # packed[..., n, p*C:(p+1)*C] is freq bin 4n+p -> interleave is a reshape.
    y = jnp.concatenate([packed.reshape(B, T, 4 * F, C5), last], axis=2)
    return jnp.transpose(y, (0, 3, 1, 2))     # (B, C5, T, 4F+1)


# ---------------------------------------------------------------------------
# synthetic parameters (PyTorch-style init), BN + conv bias folded, taps fused
# ---------------------------------------------------------------------------
def make_params(key, out_channel=32):
    """ConvTranspose2d weights are stored tap-fused as (Cin, Kt*Kf*Cout) with
    column block (kt*Kf + kf)*Cout, i.e. Wf[ci, (kt*Kf+kf)*Cout + co] ==
    W_torch[ci, co, kt, kf] (bf16 for the MXU).  BatchNorm2d (eps=1e-8,
    inference) and the conv bias are folded into per-channel (scale, shift);
    PReLU slopes use the PyTorch default 0.25.
    TODO(synk): training-mode BatchNorm (batch statistics) is not implemented.
    """
    eps = 1e-8
    layer_defs = [  # (Cin, Cout, Kt, Kf, has_bn_prelu)
        (256, 64, 2, 3, True),
        (128, 32, 2, 3, True),
        (64, 32, 2, 3, True),
        (64, 32, 2, 3, True),
        (64, out_channel, 2, 5, False),
    ]
    params = {}
    keys = jax.random.split(key, 4 * len(layer_defs))
    ki = 0
    for idx, (cin, cout, kt, kf, has_bn) in enumerate(layer_defs, start=1):
        bound = 1.0 / float(cin * kt * kf) ** 0.5
        w = jax.random.uniform(keys[ki], (cin, cout, kt, kf), jnp.float32, -bound, bound)
        b = jax.random.uniform(keys[ki + 1], (cout,), jnp.float32, -bound, bound)
        wf = jnp.transpose(w, (0, 2, 3, 1)).reshape(cin, kt * kf * cout)
        params[f"w{idx}"] = wf.astype(jnp.bfloat16)
        if has_bn:
            gamma = jnp.ones((cout,), jnp.float32)
            beta = jnp.zeros((cout,), jnp.float32)
            mean = 0.1 * jax.random.normal(keys[ki + 2], (cout,), jnp.float32)
            var = jax.random.uniform(keys[ki + 3], (cout,), jnp.float32, 0.5, 1.5)
            scale = gamma * jax.lax.rsqrt(var + eps)
            shift = b * scale + beta - mean * scale
            params[f"s{idx}"] = scale.reshape(1, cout)
            params[f"t{idx}"] = shift.reshape(1, cout)
            params[f"a{idx}"] = jnp.full((1, cout), 0.25, jnp.float32)
        else:
            # conv bias, replicated for the 4 packed output phases
            params[f"b{idx}p"] = jnp.tile(b.reshape(1, cout), (1, 4)).astype(jnp.float32)
        ki += 4
    return params


if __name__ == "__main__":
    # Shapes consistent with Decoder.forward: dprnn_out (B,128,T,F); encoder_out[4..1]
    # share (T,F); encoder_out[0] has frequency width 2F; output is (B,32,T,4F+1).
    B, T, F = 2, 8, 8
    out_channel = 32

    key = jax.random.PRNGKey(0)
    k = jax.random.split(key, 7)
    dprnn_out = jax.random.normal(k[0], (B, 128, T, F), jnp.float32)
    encoder_out = [
        jax.random.normal(k[1], (B, 32, T, 2 * F), jnp.float32),   # encoder_out[0]
        jax.random.normal(k[2], (B, 32, T, F), jnp.float32),       # encoder_out[1]
        jax.random.normal(k[3], (B, 32, T, F), jnp.float32),       # encoder_out[2]
        jax.random.normal(k[4], (B, 64, T, F), jnp.float32),       # encoder_out[3]
        jax.random.normal(k[5], (B, 128, T, F), jnp.float32),      # encoder_out[4]
    ]
    params = make_params(k[6], out_channel)

    # t_tile=4 with T=8 exercises the cross-tile time-carry path.
    fwd = jax.jit(functools.partial(decoder_forward, t_tile=4))
    out = fwd(dprnn_out, encoder_out, params)
    jax.block_until_ready(out)
    assert out.shape == (B, out_channel, T, 4 * F + 1) and out.dtype == jnp.float32
    assert bool(jnp.all(jnp.isfinite(out)))
    print("KERNEL_OK")
</pallas_src>

<mosaic_0001>
module attributes {stable_mosaic.version = 11 : i64} {
  func.func @decoder_kernel(%arg0: i32, %arg1: i32, %arg2: memref<1x4x8x128xbf16, #tpu.memory_space<vmem>>, %arg3: memref<1x4x8x128xbf16, #tpu.memory_space<vmem>>, %arg4: memref<1x4x8x64xbf16, #tpu.memory_space<vmem>>, %arg5: memref<1x4x8x128xbf16, #tpu.memory_space<vmem>>, %arg6: memref<256x384xbf16, #tpu.memory_space<vmem>>, %arg7: memref<1x64xf32, #tpu.memory_space<vmem>>, %arg8: memref<1x64xf32, #tpu.memory_space<vmem>>, %arg9: memref<1x64xf32, #tpu.memory_space<vmem>>, %arg10: memref<128x192xbf16, #tpu.memory_space<vmem>>, %arg11: memref<1x32xf32, #tpu.memory_space<vmem>>, %arg12: memref<1x32xf32, #tpu.memory_space<vmem>>, %arg13: memref<1x32xf32, #tpu.memory_space<vmem>>, %arg14: memref<64x192xbf16, #tpu.memory_space<vmem>>, %arg15: memref<1x32xf32, #tpu.memory_space<vmem>>, %arg16: memref<1x32xf32, #tpu.memory_space<vmem>>, %arg17: memref<1x32xf32, #tpu.memory_space<vmem>>, %arg18: memref<64x192xbf16, #tpu.memory_space<vmem>>, %arg19: memref<1x32xf32, #tpu.memory_space<vmem>>, %arg20: memref<1x32xf32, #tpu.memory_space<vmem>>, %arg21: memref<1x32xf32, #tpu.memory_space<vmem>>, %arg22: memref<64x320xbf16, #tpu.memory_space<vmem>>, %arg23: memref<1x128xf32, #tpu.memory_space<vmem>>, %arg24: memref<1x4x8x128xf32, #tpu.memory_space<vmem>>, %arg25: memref<1x4x1x32xf32, #tpu.memory_space<vmem>>, %arg26: memref<8x192xf32, #tpu.memory_space<vmem>>, %arg27: memref<8x96xf32, #tpu.memory_space<vmem>>, %arg28: memref<8x96xf32, #tpu.memory_space<vmem>>, %arg29: memref<8x96xf32, #tpu.memory_space<vmem>>, %arg30: memref<8x160xf32, #tpu.memory_space<vmem>>, %arg31: memref<8x160xf32, #tpu.memory_space<vmem>>) attributes {dimension_semantics = [#tpu.dimension_semantics<parallel>, #tpu.dimension_semantics<arbitrary>], iteration_bounds = array<i64: 2, 2>, scalar_prefetch = 0 : i64, scratch_operands = 6 : i64, tpu.core_type = #tpu.core_type<tc>, window_params = [{transform_indices = @transform_0, window_bounds = array<i64: 1, 4, 8, 128>}, {transform_indices = @transform_1, window_bounds = array<i64: 1, 4, 8, 128>}, {transform_indices = @transform_2, window_bounds = array<i64: 1, 4, 8, 64>}, {transform_indices = @transform_3, window_bounds = array<i64: 1, 4, 8, 128>}, {pipeline_mode = #tpu.pipeline_mode<synchronous>, transform_indices = @transform_4, window_bounds = array<i64: 256, 384>}, {pipeline_mode = #tpu.pipeline_mode<synchronous>, transform_indices = @transform_5, window_bounds = array<i64: 1, 64>}, {pipeline_mode = #tpu.pipeline_mode<synchronous>, transform_indices = @transform_6, window_bounds = array<i64: 1, 64>}, {pipeline_mode = #tpu.pipeline_mode<synchronous>, transform_indices = @transform_7, window_bounds = array<i64: 1, 64>}, {pipeline_mode = #tpu.pipeline_mode<synchronous>, transform_indices = @transform_8, window_bounds = array<i64: 128, 192>}, {pipeline_mode = #tpu.pipeline_mode<synchronous>, transform_indices = @transform_9, window_bounds = array<i64: 1, 32>}, {pipeline_mode = #tpu.pipeline_mode<synchronous>, transform_indices = @transform_10, window_bounds = array<i64: 1, 32>}, {pipeline_mode = #tpu.pipeline_mode<synchronous>, transform_indices = @transform_11, window_bounds = array<i64: 1, 32>}, {pipeline_mode = #tpu.pipeline_mode<synchronous>, transform_indices = @transform_12, window_bounds = array<i64: 64, 192>}, {pipeline_mode = #tpu.pipeline_mode<synchronous>, transform_indices = @transform_13, window_bounds = array<i64: 1, 32>}, {pipeline_mode = #tpu.pipeline_mode<synchronous>, transform_indices = @transform_14, window_bounds = array<i64: 1, 32>}, {pipeline_mode = #tpu.pipeline_mode<synchronous>, transform_indices = @transform_15, window_bounds = array<i64: 1, 32>}, {pipeline_mode = #tpu.pipeline_mode<synchronous>, transform_indices = @transform_16, window_bounds = array<i64: 64, 192>}, {pipeline_mode = #tpu.pipeline_mode<synchronous>, transform_indices = @transform_17, window_bounds = array<i64: 1, 32>}, {pipeline_mode = #tpu.pipeline_mode<synchronous>, transform_indices = @transform_18, window_bounds = array<i64: 1, 32>}, {pipeline_mode = #tpu.pipeline_mode<synchronous>, transform_indices = @transform_19, window_bounds = array<i64: 1, 32>}, {pipeline_mode = #tpu.pipeline_mode<synchronous>, transform_indices = @transform_20, window_bounds = array<i64: 64, 320>}, {pipeline_mode = #tpu.pipeline_mode<synchronous>, transform_indices = @transform_21, window_bounds = array<i64: 1, 128>}, {transform_indices = @transform_22, window_bounds = array<i64: 1, 4, 8, 128>}, {transform_indices = @transform_23, window_bounds = array<i64: 1, 4, 1, 32>}]} {
    %c0_i32 = arith.constant 0 : i32
    %0 = arith.cmpi eq, %arg1, %c0_i32 : i32
    %1 = arith.extui %0 : i1 to i32
    %c0_i32_0 = arith.constant 0 : i32
    %2 = arith.cmpi ne, %1, %c0_i32_0 : i32
    scf.if %2 {
      %cst_110 = arith.constant 0.000000e+00 : f32
      %287 = vector.broadcast %cst_110 : f32 to vector<8x192xf32>
      %c0_111 = arith.constant 0 : index
      %c0_112 = arith.constant 0 : index
      %288 = vector.load %arg26[%c0_111, %c0_112] : memref<8x192xf32, #tpu.memory_space<vmem>>, vector<8x192xf32>
      tpu.vector_store %arg26[%c0_111, %c0_112], %287 {strides = array<i32>} : memref<8x192xf32, #tpu.memory_space<vmem>>, vector<8x192xf32>,
      %cst_113 = arith.constant 0.000000e+00 : f32
      %289 = vector.broadcast %cst_113 : f32 to vector<8x96xf32>
      %c0_114 = arith.constant 0 : index
      %c0_115 = arith.constant 0 : index
      %290 = vector.load %arg27[%c0_114, %c0_115] : memref<8x96xf32, #tpu.memory_space<vmem>>, vector<8x96xf32>
      tpu.vector_store %arg27[%c0_114, %c0_115], %289 {strides = array<i32>} : memref<8x96xf32, #tpu.memory_space<vmem>>, vector<8x96xf32>,
      %cst_116 = arith.constant 0.000000e+00 : f32
      %291 = vector.broadcast %cst_116 : f32 to vector<8x96xf32>
      %c0_117 = arith.constant 0 : index
      %c0_118 = arith.constant 0 : index
      %292 = vector.load %arg28[%c0_117, %c0_118] : memref<8x96xf32, #tpu.memory_space<vmem>>, vector<8x96xf32>
      tpu.vector_store %arg28[%c0_117, %c0_118], %291 {strides = array<i32>} : memref<8x96xf32, #tpu.memory_space<vmem>>, vector<8x96xf32>,
      %cst_119 = arith.constant 0.000000e+00 : f32
      %293 = vector.broadcast %cst_119 : f32 to vector<8x96xf32>
      %c0_120 = arith.constant 0 : index
      %c0_121 = arith.constant 0 : index
      %294 = vector.load %arg29[%c0_120, %c0_121] : memref<8x96xf32, #tpu.memory_space<vmem>>, vector<8x96xf32>
      tpu.vector_store %arg29[%c0_120, %c0_121], %293 {strides = array<i32>} : memref<8x96xf32, #tpu.memory_space<vmem>>, vector<8x96xf32>,
      %cst_122 = arith.constant 0.000000e+00 : f32
      %295 = vector.broadcast %cst_122 : f32 to vector<8x160xf32>
      %c0_123 = arith.constant 0 : index
      %c0_124 = arith.constant 0 : index
      %296 = vector.load %arg30[%c0_123, %c0_124] : memref<8x160xf32, #tpu.memory_space<vmem>>, vector<8x160xf32>
      tpu.vector_store %arg30[%c0_123, %c0_124], %295 {strides = array<i32>} : memref<8x160xf32, #tpu.memory_space<vmem>>, vector<8x160xf32>,
      %cst_125 = arith.constant 0.000000e+00 : f32
      %297 = vector.broadcast %cst_125 : f32 to vector<8x160xf32>
      %c0_126 = arith.constant 0 : index
      %c0_127 = arith.constant 0 : index
      %298 = vector.load %arg31[%c0_126, %c0_127] : memref<8x160xf32, #tpu.memory_space<vmem>>, vector<8x160xf32>
      tpu.vector_store %arg31[%c0_126, %c0_127], %297 {strides = array<i32>} : memref<8x160xf32, #tpu.memory_space<vmem>>, vector<8x160xf32>,
    } else {
    }
    %c0 = arith.constant 0 : index
    %c0_1 = arith.constant 0 : index
    %c0_2 = arith.constant 0 : index
    %c0_3 = arith.constant 0 : index
    %3 = vector.load %arg2[%c0, %c0_1, %c0_2, %c0_3] : memref<1x4x8x128xbf16, #tpu.memory_space<vmem>>, vector<1x4x8x128xbf16>
    %4 = vector.shape_cast %3 : vector<1x4x8x128xbf16> to vector<4x8x128xbf16>
    %c0_4 = arith.constant 0 : index
    %c0_5 = arith.constant 0 : index
    %c0_6 = arith.constant 0 : index
    %c0_7 = arith.constant 0 : index
    %5 = vector.load %arg3[%c0_4, %c0_5, %c0_6, %c0_7] : memref<1x4x8x128xbf16, #tpu.memory_space<vmem>>, vector<1x4x8x128xbf16>
    %6 = vector.shape_cast %5 : vector<1x4x8x128xbf16> to vector<4x8x128xbf16>
    %c0_8 = arith.constant 0 : index
    %c0_9 = arith.constant 0 : index
    %c0_10 = arith.constant 0 : index
    %c0_11 = arith.constant 0 : index
    %7 = vector.load %arg4[%c0_8, %c0_9, %c0_10, %c0_11] : memref<1x4x8x64xbf16, #tpu.memory_space<vmem>>, vector<1x4x8x64xbf16>
    %8 = vector.shape_cast %7 : vector<1x4x8x64xbf16> to vector<4x8x64xbf16>
    %c0_12 = arith.constant 0 : index
    %c0_13 = arith.constant 0 : index
    %c0_14 = arith.constant 0 : index
    %c0_15 = arith.constant 0 : index
    %9 = vector.load %arg5[%c0_12, %c0_13, %c0_14, %c0_15] : memref<1x4x8x128xbf16, #tpu.memory_space<vmem>>, vector<1x4x8x128xbf16>
    %10 = vector.shape_cast %9 : vector<1x4x8x128xbf16> to vector<4x8x128xbf16>
    %11 = vector.extract_strided_slice %10 {offsets = [0, 0, 0], sizes = [4, 8, 32], strides = [1, 1, 1]} : vector<4x8x128xbf16> to vector<4x8x32xbf16>
    %12 = vector.extract_strided_slice %10 {offsets = [0, 0, 32], sizes = [4, 8, 32], strides = [1, 1, 1]} : vector<4x8x128xbf16> to vector<4x8x32xbf16>
    %13 = vector.extract_strided_slice %10 {offsets = [0, 0, 64], sizes = [4, 8, 32], strides = [1, 1, 1]} : vector<4x8x128xbf16> to vector<4x8x32xbf16>
    %14 = vector.extract_strided_slice %10 {offsets = [0, 0, 96], sizes = [4, 8, 32], strides = [1, 1, 1]} : vector<4x8x128xbf16> to vector<4x8x32xbf16>
    %c0_16 = arith.constant 0 : index
    %c0_17 = arith.constant 0 : index
    %15 = vector.load %arg7[%c0_16, %c0_17] : memref<1x64xf32, #tpu.memory_space<vmem>>, vector<1x64xf32>
    %c0_18 = arith.constant 0 : index
    %c0_19 = arith.constant 0 : index
    %16 = vector.load %arg8[%c0_18, %c0_19] : memref<1x64xf32, #tpu.memory_space<vmem>>, vector<1x64xf32>
    %c0_20 = arith.constant 0 : index
    %c0_21 = arith.constant 0 : index
    %17 = vector.load %arg9[%c0_20, %c0_21] : memref<1x64xf32, #tpu.memory_space<vmem>>, vector<1x64xf32>
    %c0_22 = arith.constant 0 : index
    %c0_23 = arith.constant 0 : index
    %18 = vector.load %arg6[%c0_22, %c0_23] : memref<256x384xbf16, #tpu.memory_space<vmem>>, vector<256x384xbf16>
    %19 = vector.shape_cast %6 : vector<4x8x128xbf16> to vector<32x128xbf16>
    %20 = vector.extract_strided_slice %18 {offsets = [0, 0], sizes = [128, 384], strides = [1, 1]} : vector<256x384xbf16> to vector<128x384xbf16>
    %cst = arith.constant dense<0.000000e+00> : vector<32x384xf32>
    %21 = tpu.matmul %19, %20, %cst {dimension_numbers = #tpu.dot_dimension_numbers<[1], [0], [0], [1], [0, 0, 1, 1], [], []>} : vector<32x128xbf16>, vector<128x384xbf16>, vector<32x384xf32> -> vector<32x384xf32>
    %22 = vector.shape_cast %4 : vector<4x8x128xbf16> to vector<32x128xbf16>
    %23 = vector.extract_strided_slice %18 {offsets = [128, 0], sizes = [128, 384], strides = [1, 1]} : vector<256x384xbf16> to vector<128x384xbf16>
    %cst_24 = arith.constant dense<0.000000e+00> : vector<32x384xf32>
    %24 = tpu.matmul %22, %23, %cst_24 {dimension_numbers = #tpu.dot_dimension_numbers<[1], [0], [0], [1], [0, 0, 1, 1], [], []>} : vector<32x128xbf16>, vector<128x384xbf16>, vector<32x384xf32> -> vector<32x384xf32>
    %25 = arith.addf %21, %24 : vector<32x384xf32>
    %26 = vector.shape_cast %25 : vector<32x384xf32> to vector<4x8x384xf32>
    %27 = vector.extract_strided_slice %26 {offsets = [0, 0, 0], sizes = [4, 8, 192], strides = [1, 1, 1]} : vector<4x8x384xf32> to vector<4x8x192xf32>
    %28 = vector.extract_strided_slice %26 {offsets = [0, 0, 192], sizes = [4, 8, 192], strides = [1, 1, 1]} : vector<4x8x384xf32> to vector<4x8x192xf32>
    %c0_25 = arith.constant 0 : index
    %c0_26 = arith.constant 0 : index
    %29 = vector.load %arg26[%c0_25, %c0_26] : memref<8x192xf32, #tpu.memory_space<vmem>>, vector<8x192xf32>
    %30 = vector.shape_cast %29 : vector<8x192xf32> to vector<1x8x192xf32>
    %31 = vector.extract_strided_slice %28 {offsets = [0, 0, 0], sizes = [3, 8, 192], strides = [1, 1, 1]} : vector<4x8x192xf32> to vector<3x8x192xf32>
    %32 = tpu.concatenate %30, %31 in 0 : vector<1x8x192xf32>, vector<3x8x192xf32> -> vector<4x8x192xf32>
    %33 = arith.addf %27, %32 : vector<4x8x192xf32>
    %34 = vector.extract_strided_slice %28 {offsets = [3, 0, 0], sizes = [1, 8, 192], strides = [1, 1, 1]} : vector<4x8x192xf32> to vector<1x8x192xf32>
    %35 = vector.shape_cast %34 : vector<1x8x192xf32> to vector<8x192xf32>
    %c0_27 = arith.constant 0 : index
    %c0_28 = arith.constant 0 : index
    %36 = vector.load %arg26[%c0_27, %c0_28] : memref<8x192xf32, #tpu.memory_space<vmem>>, vector<8x192xf32>
    tpu.vector_store %arg26[%c0_27, %c0_28], %35 {strides = array<i32>} : memref<8x192xf32, #tpu.memory_space<vmem>>, vector<8x192xf32>,
    %37 = vector.extract_strided_slice %33 {offsets = [0, 0, 0], sizes = [4, 8, 64], strides = [1, 1, 1]} : vector<4x8x192xf32> to vector<4x8x64xf32>
    %38 = vector.extract_strided_slice %37 {offsets = [0, 1, 0], sizes = [4, 7, 64], strides = [1, 1, 1]} : vector<4x8x64xf32> to vector<4x7x64xf32>
    %cst_29 = arith.constant 0.000000e+00 : f32
    %39 = vector.broadcast %cst_29 : f32 to vector<4x1x64xf32>
    %40 = tpu.concatenate %38, %39 in 1 : vector<4x7x64xf32>, vector<4x1x64xf32> -> vector<4x8x64xf32>
    %41 = vector.extract_strided_slice %33 {offsets = [0, 0, 64], sizes = [4, 8, 64], strides = [1, 1, 1]} : vector<4x8x192xf32> to vector<4x8x64xf32>
    %42 = arith.addf %40, %41 : vector<4x8x64xf32>
    %43 = vector.extract_strided_slice %33 {offsets = [0, 0, 128], sizes = [4, 8, 64], strides = [1, 1, 1]} : vector<4x8x192xf32> to vector<4x8x64xf32>
    %cst_30 = arith.constant 0.000000e+00 : f32
    %44 = vector.broadcast %cst_30 : f32 to vector<4x1x64xf32>
    %45 = vector.extract_strided_slice %43 {offsets = [0, 0, 0], sizes = [4, 7, 64], strides = [1, 1, 1]} : vector<4x8x64xf32> to vector<4x7x64xf32>
    %46 = tpu.concatenate %44, %45 in 1 : vector<4x1x64xf32>, vector<4x7x64xf32> -> vector<4x8x64xf32>
    %47 = arith.addf %42, %46 : vector<4x8x64xf32>
    %48 = vector.shape_cast %15 : vector<1x64xf32> to vector<1x1x64xf32>
    %49 = vector.broadcast %48 : vector<1x1x64xf32> to vector<4x8x64xf32>
    %50 = arith.mulf %47, %49 : vector<4x8x64xf32>
    %51 = vector.shape_cast %16 : vector<1x64xf32> to vector<1x1x64xf32>
    %52 = vector.broadcast %51 : vector<1x1x64xf32> to vector<4x8x64xf32>
    %53 = arith.addf %50, %52 : vector<4x8x64xf32>
    %cst_31 = arith.constant 0.000000e+00 : f32
    %54 = vector.broadcast %cst_31 : f32 to vector<4x8x64xf32>
    %55 = arith.cmpf oge, %53, %54 : vector<4x8x64xf32>
    %56 = vector.shape_cast %17 : vector<1x64xf32> to vector<1x1x64xf32>
    %57 = vector.broadcast %56 : vector<1x1x64xf32> to vector<4x8x64xf32>
    %58 = arith.mulf %57, %53 : vector<4x8x64xf32>
    %59 = arith.select %55, %53, %58 : vector<4x8x64xi1>, vector<4x8x64xf32>
    %60 = arith.truncf %59 : vector<4x8x64xf32> to vector<4x8x64xbf16>
    %c0_32 = arith.constant 0 : index
    %c0_33 = arith.constant 0 : index
    %61 = vector.load %arg11[%c0_32, %c0_33] : memref<1x32xf32, #tpu.memory_space<vmem>>, vector<1x32xf32>
    %c0_34 = arith.constant 0 : index
    %c0_35 = arith.constant 0 : index
    %62 = vector.load %arg12[%c0_34, %c0_35] : memref<1x32xf32, #tpu.memory_space<vmem>>, vector<1x32xf32>
    %c0_36 = arith.constant 0 : index
    %c0_37 = arith.constant 0 : index
    %63 = vector.load %arg13[%c0_36, %c0_37] : memref<1x32xf32, #tpu.memory_space<vmem>>, vector<1x32xf32>
    %c0_38 = arith.constant 0 : index
    %c0_39 = arith.constant 0 : index
    %64 = vector.load %arg10[%c0_38, %c0_39] : memref<128x192xbf16, #tpu.memory_space<vmem>>, vector<128x192xbf16>
    %65 = vector.shape_cast %8 : vector<4x8x64xbf16> to vector<32x64xbf16>
    %66 = vector.extract_strided_slice %64 {offsets = [0, 0], sizes = [64, 192], strides = [1, 1]} : vector<128x192xbf16> to vector<64x192xbf16>
    %cst_40 = arith.constant dense<0.000000e+00> : vector<32x192xf32>
    %67 = tpu.matmul %65, %66, %cst_40 {dimension_numbers = #tpu.dot_dimension_numbers<[1], [0], [0], [1], [0, 0, 1, 1], [], []>} : vector<32x64xbf16>, vector<64x192xbf16>, vector<32x192xf32> -> vector<32x192xf32>
    %68 = vector.shape_cast %60 : vector<4x8x64xbf16> to vector<32x64xbf16>
    %69 = vector.extract_strided_slice %64 {offsets = [64, 0], sizes = [64, 192], strides = [1, 1]} : vector<128x192xbf16> to vector<64x192xbf16>
    %cst_41 = arith.constant dense<0.000000e+00> : vector<32x192xf32>
    %70 = tpu.matmul %68, %69, %cst_41 {dimension_numbers = #tpu.dot_dimension_numbers<[1], [0], [0], [1], [0, 0, 1, 1], [], []>} : vector<32x64xbf16>, vector<64x192xbf16>, vector<32x192xf32> -> vector<32x192xf32>
    %71 = arith.addf %67, %70 : vector<32x192xf32>
    %72 = vector.shape_cast %71 : vector<32x192xf32> to vector<4x8x192xf32>
    %73 = vector.extract_strided_slice %72 {offsets = [0, 0, 0], sizes = [4, 8, 96], strides = [1, 1, 1]} : vector<4x8x192xf32> to vector<4x8x96xf32>
    %74 = vector.extract_strided_slice %72 {offsets = [0, 0, 96], sizes = [4, 8, 96], strides = [1, 1, 1]} : vector<4x8x192xf32> to vector<4x8x96xf32>
    %c0_42 = arith.constant 0 : index
    %c0_43 = arith.constant 0 : index
    %75 = vector.load %arg27[%c0_42, %c0_43] : memref<8x96xf32, #tpu.memory_space<vmem>>, vector<8x96xf32>
    %76 = vector.shape_cast %75 : vector<8x96xf32> to vector<1x8x96xf32>
    %77 = vector.extract_strided_slice %74 {offsets = [0, 0, 0], sizes = [3, 8, 96], strides = [1, 1, 1]} : vector<4x8x96xf32> to vector<3x8x96xf32>
    %78 = tpu.concatenate %76, %77 in 0 : vector<1x8x96xf32>, vector<3x8x96xf32> -> vector<4x8x96xf32>
    %79 = arith.addf %73, %78 : vector<4x8x96xf32>
    %80 = vector.extract_strided_slice %74 {offsets = [3, 0, 0], sizes = [1, 8, 96], strides = [1, 1, 1]} : vector<4x8x96xf32> to vector<1x8x96xf32>
    %81 = vector.shape_cast %80 : vector<1x8x96xf32> to vector<8x96xf32>
    %c0_44 = arith.constant 0 : index
    %c0_45 = arith.constant 0 : index
    %82 = vector.load %arg27[%c0_44, %c0_45] : memref<8x96xf32, #tpu.memory_space<vmem>>, vector<8x96xf32>
    tpu.vector_store %arg27[%c0_44, %c0_45], %81 {strides = array<i32>} : memref<8x96xf32, #tpu.memory_space<vmem>>, vector<8x96xf32>,
    %83 = vector.extract_strided_slice %79 {offsets = [0, 0, 0], sizes = [4, 8, 32], strides = [1, 1, 1]} : vector<4x8x96xf32> to vector<4x8x32xf32>
    %84 = vector.extract_strided_slice %83 {offsets = [0, 1, 0], sizes = [4, 7, 32], strides = [1, 1, 1]} : vector<4x8x32xf32> to vector<4x7x32xf32>
    %cst_46 = arith.constant 0.000000e+00 : f32
    %85 = vector.broadcast %cst_46 : f32 to vector<4x1x32xf32>
    %86 = tpu.concatenate %84, %85 in 1 : vector<4x7x32xf32>, vector<4x1x32xf32> -> vector<4x8x32xf32>
    %87 = vector.extract_strided_slice %79 {offsets = [0, 0, 32], sizes = [4, 8, 32], strides = [1, 1, 1]} : vector<4x8x96xf32> to vector<4x8x32xf32>
    %88 = arith.addf %86, %87 : vector<4x8x32xf32>
    %89 = vector.extract_strided_slice %79 {offsets = [0, 0, 64], sizes = [4, 8, 32], strides = [1, 1, 1]} : vector<4x8x96xf32> to vector<4x8x32xf32>
    %cst_47 = arith.constant 0.000000e+00 : f32
    %90 = vector.broadcast %cst_47 : f32 to vector<4x1x32xf32>
    %91 = vector.extract_strided_slice %89 {offsets = [0, 0, 0], sizes = [4, 7, 32], strides = [1, 1, 1]} : vector<4x8x32xf32> to vector<4x7x32xf32>
    %92 = tpu.concatenate %90, %91 in 1 : vector<4x1x32xf32>, vector<4x7x32xf32> -> vector<4x8x32xf32>
    %93 = arith.addf %88, %92 : vector<4x8x32xf32>
    %94 = vector.shape_cast %61 : vector<1x32xf32> to vector<1x1x32xf32>
    %95 = vector.broadcast %94 : vector<1x1x32xf32> to vector<4x8x32xf32>
    %96 = arith.mulf %93, %95 : vector<4x8x32xf32>
    %97 = vector.shape_cast %62 : vector<1x32xf32> to vector<1x1x32xf32>
    %98 = vector.broadcast %97 : vector<1x1x32xf32> to vector<4x8x32xf32>
    %99 = arith.addf %96, %98 : vector<4x8x32xf32>
    %cst_48 = arith.constant 0.000000e+00 : f32
    %100 = vector.broadcast %cst_48 : f32 to vector<4x8x32xf32>
    %101 = arith.cmpf oge, %99, %100 : vector<4x8x32xf32>
    %102 = vector.shape_cast %63 : vector<1x32xf32> to vector<1x1x32xf32>
    %103 = vector.broadcast %102 : vector<1x1x32xf32> to vector<4x8x32xf32>
    %104 = arith.mulf %103, %99 : vector<4x8x32xf32>
    %105 = arith.select %101, %99, %104 : vector<4x8x32xi1>, vector<4x8x32xf32>
    %106 = arith.truncf %105 : vector<4x8x32xf32> to vector<4x8x32xbf16>
    %c0_49 = arith.constant 0 : index
    %c0_50 = arith.constant 0 : index
    %107 = vector.load %arg15[%c0_49, %c0_50] : memref<1x32xf32, #tpu.memory_space<vmem>>, vector<1x32xf32>
    %c0_51 = arith.constant 0 : index
    %c0_52 = arith.constant 0 : index
    %108 = vector.load %arg16[%c0_51, %c0_52] : memref<1x32xf32, #tpu.memory_space<vmem>>, vector<1x32xf32>
    %c0_53 = arith.constant 0 : index
    %c0_54 = arith.constant 0 : index
    %109 = vector.load %arg17[%c0_53, %c0_54] : memref<1x32xf32, #tpu.memory_space<vmem>>, vector<1x32xf32>
    %c0_55 = arith.constant 0 : index
    %c0_56 = arith.constant 0 : index
    %110 = vector.load %arg14[%c0_55, %c0_56] : memref<64x192xbf16, #tpu.memory_space<vmem>>, vector<64x192xbf16>
    %111 = vector.shape_cast %11 : vector<4x8x32xbf16> to vector<32x32xbf16>
    %112 = vector.extract_strided_slice %110 {offsets = [0, 0], sizes = [32, 192], strides = [1, 1]} : vector<64x192xbf16> to vector<32x192xbf16>
    %cst_57 = arith.constant dense<0.000000e+00> : vector<32x192xf32>
    %113 = tpu.matmul %111, %112, %cst_57 {dimension_numbers = #tpu.dot_dimension_numbers<[1], [0], [0], [1], [0, 0, 1, 1], [], []>} : vector<32x32xbf16>, vector<32x192xbf16>, vector<32x192xf32> -> vector<32x192xf32>
    %114 = vector.shape_cast %106 : vector<4x8x32xbf16> to vector<32x32xbf16>
    %115 = vector.extract_strided_slice %110 {offsets = [32, 0], sizes = [32, 192], strides = [1, 1]} : vector<64x192xbf16> to vector<32x192xbf16>
    %cst_58 = arith.constant dense<0.000000e+00> : vector<32x192xf32>
    %116 = tpu.matmul %114, %115, %cst_58 {dimension_numbers = #tpu.dot_dimension_numbers<[1], [0], [0], [1], [0, 0, 1, 1], [], []>} : vector<32x32xbf16>, vector<32x192xbf16>, vector<32x192xf32> -> vector<32x192xf32>
    %117 = arith.addf %113, %116 : vector<32x192xf32>
    %118 = vector.shape_cast %117 : vector<32x192xf32> to vector<4x8x192xf32>
    %119 = vector.extract_strided_slice %118 {offsets = [0, 0, 0], sizes = [4, 8, 96], strides = [1, 1, 1]} : vector<4x8x192xf32> to vector<4x8x96xf32>
    %120 = vector.extract_strided_slice %118 {offsets = [0, 0, 96], sizes = [4, 8, 96], strides = [1, 1, 1]} : vector<4x8x192xf32> to vector<4x8x96xf32>
    %c0_59 = arith.constant 0 : index
    %c0_60 = arith.constant 0 : index
    %121 = vector.load %arg28[%c0_59, %c0_60] : memref<8x96xf32, #tpu.memory_space<vmem>>, vector<8x96xf32>
    %122 = vector.shape_cast %121 : vector<8x96xf32> to vector<1x8x96xf32>
    %123 = vector.extract_strided_slice %120 {offsets = [0, 0, 0], sizes = [3, 8, 96], strides = [1, 1, 1]} : vector<4x8x96xf32> to vector<3x8x96xf32>
    %124 = tpu.concatenate %122, %123 in 0 : vector<1x8x96xf32>, vector<3x8x96xf32> -> vector<4x8x96xf32>
    %125 = arith.addf %119, %124 : vector<4x8x96xf32>
    %126 = vector.extract_strided_slice %120 {offsets = [3, 0, 0], sizes = [1, 8, 96], strides = [1, 1, 1]} : vector<4x8x96xf32> to vector<1x8x96xf32>
    %127 = vector.shape_cast %126 : vector<1x8x96xf32> to vector<8x96xf32>
    %c0_61 = arith.constant 0 : index
    %c0_62 = arith.constant 0 : index
    %128 = vector.load %arg28[%c0_61, %c0_62] : memref<8x96xf32, #tpu.memory_space<vmem>>, vector<8x96xf32>
    tpu.vector_store %arg28[%c0_61, %c0_62], %127 {strides = array<i32>} : memref<8x96xf32, #tpu.memory_space<vmem>>, vector<8x96xf32>,
    %129 = vector.extract_strided_slice %125 {offsets = [0, 0, 0], sizes = [4, 8, 32], strides = [1, 1, 1]} : vector<4x8x96xf32> to vector<4x8x32xf32>
    %130 = vector.extract_strided_slice %129 {offsets = [0, 1, 0], sizes = [4, 7, 32], strides = [1, 1, 1]} : vector<4x8x32xf32> to vector<4x7x32xf32>
    %cst_63 = arith.constant 0.000000e+00 : f32
    %131 = vector.broadcast %cst_63 : f32 to vector<4x1x32xf32>
    %132 = tpu.concatenate %130, %131 in 1 : vector<4x7x32xf32>, vector<4x1x32xf32> -> vector<4x8x32xf32>
    %133 = vector.extract_strided_slice %125 {offsets = [0, 0, 32], sizes = [4, 8, 32], strides = [1, 1, 1]} : vector<4x8x96xf32> to vector<4x8x32xf32>
    %134 = arith.addf %132, %133 : vector<4x8x32xf32>
    %135 = vector.extract_strided_slice %125 {offsets = [0, 0, 64], sizes = [4, 8, 32], strides = [1, 1, 1]} : vector<4x8x96xf32> to vector<4x8x32xf32>
    %cst_64 = arith.constant 0.000000e+00 : f32
    %136 = vector.broadcast %cst_64 : f32 to vector<4x1x32xf32>
    %137 = vector.extract_strided_slice %135 {offsets = [0, 0, 0], sizes = [4, 7, 32], strides = [1, 1, 1]} : vector<4x8x32xf32> to vector<4x7x32xf32>
    %138 = tpu.concatenate %136, %137 in 1 : vector<4x1x32xf32>, vector<4x7x32xf32> -> vector<4x8x32xf32>
    %139 = arith.addf %134, %138 : vector<4x8x32xf32>
    %140 = vector.shape_cast %107 : vector<1x32xf32> to vector<1x1x32xf32>
    %141 = vector.broadcast %140 : vector<1x1x32xf32> to vector<4x8x32xf32>
    %142 = arith.mulf %139, %141 : vector<4x8x32xf32>
    %143 = vector.shape_cast %108 : vector<1x32xf32> to vector<1x1x32xf32>
    %144 = vector.broadcast %143 : vector<1x1x32xf32> to vector<4x8x32xf32>
    %145 = arith.addf %142, %144 : vector<4x8x32xf32>
    %cst_65 = arith.constant 0.000000e+00 : f32
    %146 = vector.broadcast %cst_65 : f32 to vector<4x8x32xf32>
    %147 = arith.cmpf oge, %145, %146 : vector<4x8x32xf32>
    %148 = vector.shape_cast %109 : vector<1x32xf32> to vector<1x1x32xf32>
    %149 = vector.broadcast %148 : vector<1x1x32xf32> to vector<4x8x32xf32>
    %150 = arith.mulf %149, %145 : vector<4x8x32xf32>
    %151 = arith.select %147, %145, %150 : vector<4x8x32xi1>, vector<4x8x32xf32>
    %152 = arith.truncf %151 : vector<4x8x32xf32> to vector<4x8x32xbf16>
    %c0_66 = arith.constant 0 : index
    %c0_67 = arith.constant 0 : index
    %153 = vector.load %arg19[%c0_66, %c0_67] : memref<1x32xf32, #tpu.memory_space<vmem>>, vector<1x32xf32>
    %c0_68 = arith.constant 0 : index
    %c0_69 = arith.constant 0 : index
    %154 = vector.load %arg20[%c0_68, %c0_69] : memref<1x32xf32, #tpu.memory_space<vmem>>, vector<1x32xf32>
    %c0_70 = arith.constant 0 : index
    %c0_71 = arith.constant 0 : index
    %155 = vector.load %arg21[%c0_70, %c0_71] : memref<1x32xf32, #tpu.memory_space<vmem>>, vector<1x32xf32>
    %c0_72 = arith.constant 0 : index
    %c0_73 = arith.constant 0 : index
    %156 = vector.load %arg18[%c0_72, %c0_73] : memref<64x192xbf16, #tpu.memory_space<vmem>>, vector<64x192xbf16>
    %157 = vector.shape_cast %12 : vector<4x8x32xbf16> to vector<32x32xbf16>
    %158 = vector.extract_strided_slice %156 {offsets = [0, 0], sizes = [32, 192], strides = [1, 1]} : vector<64x192xbf16> to vector<32x192xbf16>
    %cst_74 = arith.constant dense<0.000000e+00> : vector<32x192xf32>
    %159 = tpu.matmul %157, %158, %cst_74 {dimension_numbers = #tpu.dot_dimension_numbers<[1], [0], [0], [1], [0, 0, 1, 1], [], []>} : vector<32x32xbf16>, vector<32x192xbf16>, vector<32x192xf32> -> vector<32x192xf32>
    %160 = vector.shape_cast %152 : vector<4x8x32xbf16> to vector<32x32xbf16>
    %161 = vector.extract_strided_slice %156 {offsets = [32, 0], sizes = [32, 192], strides = [1, 1]} : vector<64x192xbf16> to vector<32x192xbf16>
    %cst_75 = arith.constant dense<0.000000e+00> : vector<32x192xf32>
    %162 = tpu.matmul %160, %161, %cst_75 {dimension_numbers = #tpu.dot_dimension_numbers<[1], [0], [0], [1], [0, 0, 1, 1], [], []>} : vector<32x32xbf16>, vector<32x192xbf16>, vector<32x192xf32> -> vector<32x192xf32>
    %163 = arith.addf %159, %162 : vector<32x192xf32>
    %164 = vector.shape_cast %163 : vector<32x192xf32> to vector<4x8x192xf32>
    %165 = vector.extract_strided_slice %164 {offsets = [0, 0, 0], sizes = [4, 8, 96], strides = [1, 1, 1]} : vector<4x8x192xf32> to vector<4x8x96xf32>
    %166 = vector.extract_strided_slice %164 {offsets = [0, 0, 96], sizes = [4, 8, 96], strides = [1, 1, 1]} : vector<4x8x192xf32> to vector<4x8x96xf32>
    %c0_76 = arith.constant 0 : index
    %c0_77 = arith.constant 0 : index
    %167 = vector.load %arg29[%c0_76, %c0_77] : memref<8x96xf32, #tpu.memory_space<vmem>>, vector<8x96xf32>
    %168 = vector.shape_cast %167 : vector<8x96xf32> to vector<1x8x96xf32>
    %169 = vector.extract_strided_slice %166 {offsets = [0, 0, 0], sizes = [3, 8, 96], strides = [1, 1, 1]} : vector<4x8x96xf32> to vector<3x8x96xf32>
    %170 = tpu.concatenate %168, %169 in 0 : vector<1x8x96xf32>, vector<3x8x96xf32> -> vector<4x8x96xf32>
    %171 = arith.addf %165, %170 : vector<4x8x96xf32>
    %172 = vector.extract_strided_slice %166 {offsets = [3, 0, 0], sizes = [1, 8, 96], strides = [1, 1, 1]} : vector<4x8x96xf32> to vector<1x8x96xf32>
    %173 = vector.shape_cast %172 : vector<1x8x96xf32> to vector<8x96xf32>
    %c0_78 = arith.constant 0 : index
    %c0_79 = arith.constant 0 : index
    %174 = vector.load %arg29[%c0_78, %c0_79] : memref<8x96xf32, #tpu.memory_space<vmem>>, vector<8x96xf32>
    tpu.vector_store %arg29[%c0_78, %c0_79], %173 {strides = array<i32>} : memref<8x96xf32, #tpu.memory_space<vmem>>, vector<8x96xf32>,
    %175 = vector.extract_strided_slice %171 {offsets = [0, 0, 0], sizes = [4, 8, 32], strides = [1, 1, 1]} : vector<4x8x96xf32> to vector<4x8x32xf32>
    %176 = vector.extract_strided_slice %171 {offsets = [0, 0, 64], sizes = [4, 8, 32], strides = [1, 1, 1]} : vector<4x8x96xf32> to vector<4x8x32xf32>
    %cst_80 = arith.constant 0.000000e+00 : f32
    %177 = vector.broadcast %cst_80 : f32 to vector<4x1x32xf32>
    %178 = vector.extract_strided_slice %176 {offsets = [0, 0, 0], sizes = [4, 7, 32], strides = [1, 1, 1]} : vector<4x8x32xf32> to vector<4x7x32xf32>
    %179 = tpu.concatenate %177, %178 in 1 : vector<4x1x32xf32>, vector<4x7x32xf32> -> vector<4x8x32xf32>
    %180 = arith.addf %175, %179 : vector<4x8x32xf32>
    %181 = vector.extract_strided_slice %171 {offsets = [0, 0, 32], sizes = [4, 8, 32], strides = [1, 1, 1]} : vector<4x8x96xf32> to vector<4x8x32xf32>
    %182 = vector.shape_cast %153 : vector<1x32xf32> to vector<1x1x32xf32>
    %183 = vector.broadcast %182 : vector<1x1x32xf32> to vector<4x8x32xf32>
    %184 = arith.mulf %180, %183 : vector<4x8x32xf32>
    %185 = vector.shape_cast %154 : vector<1x32xf32> to vector<1x1x32xf32>
    %186 = vector.broadcast %185 : vector<1x1x32xf32> to vector<4x8x32xf32>
    %187 = arith.addf %184, %186 : vector<4x8x32xf32>
    %cst_81 = arith.constant 0.000000e+00 : f32
    %188 = vector.broadcast %cst_81 : f32 to vector<4x8x32xf32>
    %189 = arith.cmpf oge, %187, %188 : vector<4x8x32xf32>
    %190 = vector.shape_cast %155 : vector<1x32xf32> to vector<1x1x32xf32>
    %191 = vector.broadcast %190 : vector<1x1x32xf32> to vector<4x8x32xf32>
    %192 = arith.mulf %191, %187 : vector<4x8x32xf32>
    %193 = arith.select %189, %187, %192 : vector<4x8x32xi1>, vector<4x8x32xf32>
    %194 = arith.truncf %193 : vector<4x8x32xf32> to vector<4x8x32xbf16>
    %195 = vector.shape_cast %153 : vector<1x32xf32> to vector<1x1x32xf32>
    %196 = vector.broadcast %195 : vector<1x1x32xf32> to vector<4x8x32xf32>
    %197 = arith.mulf %181, %196 : vector<4x8x32xf32>
    %198 = vector.shape_cast %154 : vector<1x32xf32> to vector<1x1x32xf32>
    %199 = vector.broadcast %198 : vector<1x1x32xf32> to vector<4x8x32xf32>
    %200 = arith.addf %197, %199 : vector<4x8x32xf32>
    %cst_82 = arith.constant 0.000000e+00 : f32
    %201 = vector.broadcast %cst_82 : f32 to vector<4x8x32xf32>
    %202 = arith.cmpf oge, %200, %201 : vector<4x8x32xf32>
    %203 = vector.shape_cast %155 : vector<1x32xf32> to vector<1x1x32xf32>
    %204 = vector.broadcast %203 : vector<1x1x32xf32> to vector<4x8x32xf32>
    %205 = arith.mulf %204, %200 : vector<4x8x32xf32>
    %206 = arith.select %202, %200, %205 : vector<4x8x32xi1>, vector<4x8x32xf32>
    %207 = arith.truncf %206 : vector<4x8x32xf32> to vector<4x8x32xbf16>
    %c0_83 = arith.constant 0 : index
    %c0_84 = arith.constant 0 : index
    %208 = vector.load %arg23[%c0_83, %c0_84] : memref<1x128xf32, #tpu.memory_space<vmem>>, vector<1x128xf32>
    %c0_85 = arith.constant 0 : index
    %c0_86 = arith.constant 0 : index
    %209 = vector.load %arg22[%c0_85, %c0_86] : memref<64x320xbf16, #tpu.memory_space<vmem>>, vector<64x320xbf16>
    %210 = vector.shape_cast %13 : vector<4x8x32xbf16> to vector<32x32xbf16>
    %211 = vector.extract_strided_slice %209 {offsets = [0, 0], sizes = [32, 320], strides = [1, 1]} : vector<64x320xbf16> to vector<32x320xbf16>
    %cst_87 = arith.constant dense<0.000000e+00> : vector<32x320xf32>
    %212 = tpu.matmul %210, %211, %cst_87 {dimension_numbers = #tpu.dot_dimension_numbers<[1], [0], [0], [1], [0, 0, 1, 1], [], []>} : vector<32x32xbf16>, vector<32x320xbf16>, vector<32x320xf32> -> vector<32x320xf32>
    %213 = vector.shape_cast %194 : vector<4x8x32xbf16> to vector<32x32xbf16>
    %214 = vector.extract_strided_slice %209 {offsets = [32, 0], sizes = [32, 320], strides = [1, 1]} : vector<64x320xbf16> to vector<32x320xbf16>
    %cst_88 = arith.constant dense<0.000000e+00> : vector<32x320xf32>
    %215 = tpu.matmul %213, %214, %cst_88 {dimension_numbers = #tpu.dot_dimension_numbers<[1], [0], [0], [1], [0, 0, 1, 1], [], []>} : vector<32x32xbf16>, vector<32x320xbf16>, vector<32x320xf32> -> vector<32x320xf32>
    %216 = arith.addf %212, %215 : vector<32x320xf32>
    %217 = vector.shape_cast %216 : vector<32x320xf32> to vector<4x8x320xf32>
    %218 = vector.extract_strided_slice %217 {offsets = [0, 0, 0], sizes = [4, 8, 160], strides = [1, 1, 1]} : vector<4x8x320xf32> to vector<4x8x160xf32>
    %219 = vector.extract_strided_slice %217 {offsets = [0, 0, 160], sizes = [4, 8, 160], strides = [1, 1, 1]} : vector<4x8x320xf32> to vector<4x8x160xf32>
    %c0_89 = arith.constant 0 : index
    %c0_90 = arith.constant 0 : index
    %220 = vector.load %arg30[%c0_89, %c0_90] : memref<8x160xf32, #tpu.memory_space<vmem>>, vector<8x160xf32>
    %221 = vector.shape_cast %220 : vector<8x160xf32> to vector<1x8x160xf32>
    %222 = vector.extract_strided_slice %219 {offsets = [0, 0, 0], sizes = [3, 8, 160], strides = [1, 1, 1]} : vector<4x8x160xf32> to vector<3x8x160xf32>
    %223 = tpu.concatenate %221, %222 in 0 : vector<1x8x160xf32>, vector<3x8x160xf32> -> vector<4x8x160xf32>
    %224 = arith.addf %218, %223 : vector<4x8x160xf32>
    %225 = vector.extract_strided_slice %219 {offsets = [3, 0, 0], sizes = [1, 8, 160], strides = [1, 1, 1]} : vector<4x8x160xf32> to vector<1x8x160xf32>
    %226 = vector.shape_cast %225 : vector<1x8x160xf32> to vector<8x160xf32>
    %c0_91 = arith.constant 0 : index
    %c0_92 = arith.constant 0 : index
    %227 = vector.load %arg30[%c0_91, %c0_92] : memref<8x160xf32, #tpu.memory_space<vmem>>, vector<8x160xf32>
    tpu.vector_store %arg30[%c0_91, %c0_92], %226 {strides = array<i32>} : memref<8x160xf32, #tpu.memory_space<vmem>>, vector<8x160xf32>,
    %228 = vector.shape_cast %14 : vector<4x8x32xbf16> to vector<32x32xbf16>
    %229 = vector.extract_strided_slice %209 {offsets = [0, 0], sizes = [32, 320], strides = [1, 1]} : vector<64x320xbf16> to vector<32x320xbf16>
    %cst_93 = arith.constant dense<0.000000e+00> : vector<32x320xf32>
    %230 = tpu.matmul %228, %229, %cst_93 {dimension_numbers = #tpu.dot_dimension_numbers<[1], [0], [0], [1], [0, 0, 1, 1], [], []>} : vector<32x32xbf16>, vector<32x320xbf16>, vector<32x320xf32> -> vector<32x320xf32>
    %231 = vector.shape_cast %207 : vector<4x8x32xbf16> to vector<32x32xbf16>
    %232 = vector.extract_strided_slice %209 {offsets = [32, 0], sizes = [32, 320], strides = [1, 1]} : vector<64x320xbf16> to vector<32x320xbf16>
    %cst_94 = arith.constant dense<0.000000e+00> : vector<32x320xf32>
    %233 = tpu.matmul %231, %232, %cst_94 {dimension_numbers = #tpu.dot_dimension_numbers<[1], [0], [0], [1], [0, 0, 1, 1], [], []>} : vector<32x32xbf16>, vector<32x320xbf16>, vector<32x320xf32> -> vector<32x320xf32>
    %234 = arith.addf %230, %233 : vector<32x320xf32>
    %235 = vector.shape_cast %234 : vector<32x320xf32> to vector<4x8x320xf32>
    %236 = vector.extract_strided_slice %235 {offsets = [0, 0, 0], sizes = [4, 8, 160], strides = [1, 1, 1]} : vector<4x8x320xf32> to vector<4x8x160xf32>
    %237 = vector.extract_strided_slice %235 {offsets = [0, 0, 160], sizes = [4, 8, 160], strides = [1, 1, 1]} : vector<4x8x320xf32> to vector<4x8x160xf32>
    %c0_95 = arith.constant 0 : index
    %c0_96 = arith.constant 0 : index
    %238 = vector.load %arg31[%c0_95, %c0_96] : memref<8x160xf32, #tpu.memory_space<vmem>>, vector<8x160xf32>
    %239 = vector.shape_cast %238 : vector<8x160xf32> to vector<1x8x160xf32>
    %240 = vector.extract_strided_slice %237 {offsets = [0, 0, 0], sizes = [3, 8, 160], strides = [1, 1, 1]} : vector<4x8x160xf32> to vector<3x8x160xf32>
    %241 = tpu.concatenate %239, %240 in 0 : vector<1x8x160xf32>, vector<3x8x160xf32> -> vector<4x8x160xf32>
    %242 = arith.addf %236, %241 : vector<4x8x160xf32>
    %243 = vector.extract_strided_slice %237 {offsets = [3, 0, 0], sizes = [1, 8, 160], strides = [1, 1, 1]} : vector<4x8x160xf32> to vector<1x8x160xf32>
    %244 = vector.shape_cast %243 : vector<1x8x160xf32> to vector<8x160xf32>
    %c0_97 = arith.constant 0 : index
    %c0_98 = arith.constant 0 : index
    %245 = vector.load %arg31[%c0_97, %c0_98] : memref<8x160xf32, #tpu.memory_space<vmem>>, vector<8x160xf32>
    tpu.vector_store %arg31[%c0_97, %c0_98], %244 {strides = array<i32>} : memref<8x160xf32, #tpu.memory_space<vmem>>, vector<8x160xf32>,
    %246 = vector.extract_strided_slice %224 {offsets = [0, 0, 32], sizes = [4, 8, 32], strides = [1, 1, 1]} : vector<4x8x160xf32> to vector<4x8x32xf32>
    %247 = vector.extract_strided_slice %242 {offsets = [0, 0, 96], sizes = [4, 8, 32], strides = [1, 1, 1]} : vector<4x8x160xf32> to vector<4x8x32xf32>
    %cst_99 = arith.constant 0.000000e+00 : f32
    %248 = vector.broadcast %cst_99 : f32 to vector<4x1x32xf32>
    %249 = vector.extract_strided_slice %247 {offsets = [0, 0, 0], sizes = [4, 7, 32], strides = [1, 1, 1]} : vector<4x8x32xf32> to vector<4x7x32xf32>
    %250 = tpu.concatenate %248, %249 in 1 : vector<4x1x32xf32>, vector<4x7x32xf32> -> vector<4x8x32xf32>
    %251 = arith.addf %246, %250 : vector<4x8x32xf32>
    %252 = vector.extract_strided_slice %242 {offsets = [0, 0, 0], sizes = [4, 8, 32], strides = [1, 1, 1]} : vector<4x8x160xf32> to vector<4x8x32xf32>
    %253 = vector.extract_strided_slice %224 {offsets = [0, 0, 64], sizes = [4, 8, 32], strides = [1, 1, 1]} : vector<4x8x160xf32> to vector<4x8x32xf32>
    %254 = arith.addf %252, %253 : vector<4x8x32xf32>
    %255 = vector.extract_strided_slice %242 {offsets = [0, 0, 128], sizes = [4, 8, 32], strides = [1, 1, 1]} : vector<4x8x160xf32> to vector<4x8x32xf32>
    %cst_100 = arith.constant 0.000000e+00 : f32
    %256 = vector.broadcast %cst_100 : f32 to vector<4x1x32xf32>
    %257 = vector.extract_strided_slice %255 {offsets = [0, 0, 0], sizes = [4, 7, 32], strides = [1, 1, 1]} : vector<4x8x32xf32> to vector<4x7x32xf32>
    %258 = tpu.concatenate %256, %257 in 1 : vector<4x1x32xf32>, vector<4x7x32xf32> -> vector<4x8x32xf32>
    %259 = arith.addf %254, %258 : vector<4x8x32xf32>
    %260 = vector.extract_strided_slice %242 {offsets = [0, 0, 32], sizes = [4, 8, 32], strides = [1, 1, 1]} : vector<4x8x160xf32> to vector<4x8x32xf32>
    %261 = vector.extract_strided_slice %224 {offsets = [0, 0, 96], sizes = [4, 8, 32], strides = [1, 1, 1]} : vector<4x8x160xf32> to vector<4x8x32xf32>
    %262 = arith.addf %260, %261 : vector<4x8x32xf32>
    %263 = vector.extract_strided_slice %224 {offsets = [0, 0, 0], sizes = [4, 8, 32], strides = [1, 1, 1]} : vector<4x8x160xf32> to vector<4x8x32xf32>
    %264 = vector.extract_strided_slice %263 {offsets = [0, 1, 0], sizes = [4, 7, 32], strides = [1, 1, 1]} : vector<4x8x32xf32> to vector<4x7x32xf32>
    %cst_101 = arith.constant 0.000000e+00 : f32
    %265 = vector.broadcast %cst_101 : f32 to vector<4x1x32xf32>
    %266 = tpu.concatenate %264, %265 in 1 : vector<4x7x32xf32>, vector<4x1x32xf32> -> vector<4x8x32xf32>
    %267 = vector.extract_strided_slice %242 {offsets = [0, 0, 64], sizes = [4, 8, 32], strides = [1, 1, 1]} : vector<4x8x160xf32> to vector<4x8x32xf32>
    %268 = arith.addf %266, %267 : vector<4x8x32xf32>
    %269 = vector.extract_strided_slice %224 {offsets = [0, 0, 128], sizes = [4, 8, 32], strides = [1, 1, 1]} : vector<4x8x160xf32> to vector<4x8x32xf32>
    %270 = arith.addf %268, %269 : vector<4x8x32xf32>
    %271 = tpu.concatenate %251, %259, %262, %270 in 2 : vector<4x8x32xf32>, vector<4x8x32xf32>, vector<4x8x32xf32>, vector<4x8x32xf32> -> vector<4x8x128xf32>
    %272 = vector.shape_cast %208 : vector<1x128xf32> to vector<1x1x128xf32>
    %273 = vector.broadcast %272 : vector<1x1x128xf32> to vector<4x8x128xf32>
    %274 = arith.addf %271, %273 : vector<4x8x128xf32>
    %275 = vector.extract_strided_slice %242 {offsets = [0, 0, 96], sizes = [4, 8, 32], strides = [1, 1, 1]} : vector<4x8x160xf32> to vector<4x8x32xf32>
    %276 = vector.extract_strided_slice %275 {offsets = [0, 7, 0], sizes = [4, 1, 32], strides = [1, 1, 1]} : vector<4x8x32xf32> to vector<4x1x32xf32>
    %277 = vector.extract_strided_slice %208 {offsets = [0, 0], sizes = [1, 32], strides = [1, 1]} : vector<1x128xf32> to vector<1x32xf32>
    %278 = vector.shape_cast %277 : vector<1x32xf32> to vector<1x1x32xf32>
    %279 = vector.broadcast %278 : vector<1x1x32xf32> to vector<4x1x32xf32>
    %280 = arith.addf %276, %279 : vector<4x1x32xf32>
    %c0_102 = arith.constant 0 : index
    %c0_103 = arith.constant 0 : index
    %c0_104 = arith.constant 0 : index
    %c0_105 = arith.constant 0 : index
    %281 = vector.load %arg24[%c0_102, %c0_103, %c0_104, %c0_105] : memref<1x4x8x128xf32, #tpu.memory_space<vmem>>, vector<1x4x8x128xf32>
    %282 = vector.shape_cast %281 : vector<1x4x8x128xf32> to vector<4x8x128xf32>
    %283 = vector.shape_cast %274 : vector<4x8x128xf32> to vector<1x4x8x128xf32>
    tpu.vector_store %arg24[%c0_102, %c0_103, %c0_104, %c0_105], %283 {strides = array<i32>} : memref<1x4x8x128xf32, #tpu.memory_space<vmem>>, vector<1x4x8x128xf32>,
    %c0_106 = arith.constant 0 : index
    %c0_107 = arith.constant 0 : index
    %c0_108 = arith.constant 0 : index
    %c0_109 = arith.constant 0 : index
    %284 = vector.load %arg25[%c0_106, %c0_107, %c0_108, %c0_109] : memref<1x4x1x32xf32, #tpu.memory_space<vmem>>, vector<1x4x1x32xf32>
    %285 = vector.shape_cast %284 : vector<1x4x1x32xf32> to vector<4x1x32xf32>
    %286 = vector.shape_cast %280 : vector<4x1x32xf32> to vector<1x4x1x32xf32>
    tpu.vector_store %arg25[%c0_106, %c0_107, %c0_108, %c0_109], %286 {strides = array<i32>} : memref<1x4x1x32xf32, #tpu.memory_space<vmem>>, vector<1x4x1x32xf32>,
    return
  }
  func.func @transform_0(%arg0: i32, %arg1: i32) -> (i32, i32, i32, i32) {
    %c0_i32 = arith.constant 0 : i32
    %c0_i32_0 = arith.constant 0 : i32
    %c0_i32_1 = arith.constant 0 : i32
    return %arg0, %arg1, %c0_i32, %c0_i32_0 : i32, i32, i32, i32
  }
  func.func @transform_1(%arg0: i32, %arg1: i32) -> (i32, i32, i32, i32) {
    %c0_i32 = arith.constant 0 : i32
    %c0_i32_0 = arith.constant 0 : i32
    %c0_i32_1 = arith.constant 0 : i32
    return %arg0, %arg1, %c0_i32, %c0_i32_0 : i32, i32, i32, i32
  }
  func.func @transform_2(%arg0: i32, %arg1: i32) -> (i32, i32, i32, i32) {
    %c0_i32 = arith.constant 0 : i32
    %c0_i32_0 = arith.constant 0 : i32
    %c0_i32_1 = arith.constant 0 : i32
    return %arg0, %arg1, %c0_i32, %c0_i32_0 : i32, i32, i32, i32
  }
  func.func @transform_3(%arg0: i32, %arg1: i32) -> (i32, i32, i32, i32) {
    %c0_i32 = arith.constant 0 : i32
    %c0_i32_0 = arith.constant 0 : i32
    %c0_i32_1 = arith.constant 0 : i32
    return %arg0, %arg1, %c0_i32, %c0_i32_0 : i32, i32, i32, i32
  }
  func.func @transform_4(%arg0: i32, %arg1: i32) -> (i32, i32) {
    %c0_i32 = arith.constant 0 : i32
    %c0_i32_0 = arith.constant 0 : i32
    %c0_i32_1 = arith.constant 0 : i32
    return %c0_i32, %c0_i32_0 : i32, i32
  }
  func.func @transform_5(%arg0: i32, %arg1: i32) -> (i32, i32) {
    %c0_i32 = arith.constant 0 : i32
    %c0_i32_0 = arith.constant 0 : i32
    %c0_i32_1 = arith.constant 0 : i32
    return %c0_i32, %c0_i32_0 : i32, i32
  }
  func.func @transform_6(%arg0: i32, %arg1: i32) -> (i32, i32) {
    %c0_i32 = arith.constant 0 : i32
    %c0_i32_0 = arith.constant 0 : i32
    %c0_i32_1 = arith.constant 0 : i32
    return %c0_i32, %c0_i32_0 : i32, i32
  }
  func.func @transform_7(%arg0: i32, %arg1: i32) -> (i32, i32) {
    %c0_i32 = arith.constant 0 : i32
    %c0_i32_0 = arith.constant 0 : i32
    %c0_i32_1 = arith.constant 0 : i32
    return %c0_i32, %c0_i32_0 : i32, i32
  }
  func.func @transform_8(%arg0: i32, %arg1: i32) -> (i32, i32) {
    %c0_i32 = arith.constant 0 : i32
    %c0_i32_0 = arith.constant 0 : i32
    %c0_i32_1 = arith.constant 0 : i32
    return %c0_i32, %c0_i32_0 : i32, i32
  }
  func.func @transform_9(%arg0: i32, %arg1: i32) -> (i32, i32) {
    %c0_i32 = arith.constant 0 : i32
    %c0_i32_0 = arith.constant 0 : i32
    %c0_i32_1 = arith.constant 0 : i32
    return %c0_i32, %c0_i32_0 : i32, i32
  }
  func.func @transform_10(%arg0: i32, %arg1: i32) -> (i32, i32) {
    %c0_i32 = arith.constant 0 : i32
    %c0_i32_0 = arith.constant 0 : i32
    %c0_i32_1 = arith.constant 0 : i32
    return %c0_i32, %c0_i32_0 : i32, i32
  }
  func.func @transform_11(%arg0: i32, %arg1: i32) -> (i32, i32) {
    %c0_i32 = arith.constant 0 : i32
    %c0_i32_0 = arith.constant 0 : i32
    %c0_i32_1 = arith.constant 0 : i32
    return %c0_i32, %c0_i32_0 : i32, i32
  }
  func.func @transform_12(%arg0: i32, %arg1: i32) -> (i32, i32) {
    %c0_i32 = arith.constant 0 : i32
    %c0_i32_0 = arith.constant 0 : i32
    %c0_i32_1 = arith.constant 0 : i32
    return %c0_i32, %c0_i32_0 : i32, i32
  }
  func.func @transform_13(%arg0: i32, %arg1: i32) -> (i32, i32) {
    %c0_i32 = arith.constant 0 : i32
    %c0_i32_0 = arith.constant 0 : i32
    %c0_i32_1 = arith.constant 0 : i32
    return %c0_i32, %c0_i32_0 : i32, i32
  }
  func.func @transform_14(%arg0: i32, %arg1: i32) -> (i32, i32) {
    %c0_i32 = arith.constant 0 : i32
    %c0_i32_0 = arith.constant 0 : i32
    %c0_i32_1 = arith.constant 0 : i32
    return %c0_i32, %c0_i32_0 : i32, i32
  }
  func.func @transform_15(%arg0: i32, %arg1: i32) -> (i32, i32) {
    %c0_i32 = arith.constant 0 : i32
    %c0_i32_0 = arith.constant 0 : i32
    %c0_i32_1 = arith.constant 0 : i32
    return %c0_i32, %c0_i32_0 : i32, i32
  }
  func.func @transform_16(%arg0: i32, %arg1: i32) -> (i32, i32) {
    %c0_i32 = arith.constant 0 : i32
    %c0_i32_0 = arith.constant 0 : i32
    %c0_i32_1 = arith.constant 0 : i32
    return %c0_i32, %c0_i32_0 : i32, i32
  }
  func.func @transform_17(%arg0: i32, %arg1: i32) -> (i32, i32) {
    %c0_i32 = arith.constant 0 : i32
    %c0_i32_0 = arith.constant 0 : i32
    %c0_i32_1 = arith.constant 0 : i32
    return %c0_i32, %c0_i32_0 : i32, i32
  }
  func.func @transform_18(%arg0: i32, %arg1: i32) -> (i32, i32) {
    %c0_i32 = arith.constant 0 : i32
    %c0_i32_0 = arith.constant 0 : i32
    %c0_i32_1 = arith.constant 0 : i32
    return %c0_i32, %c0_i32_0 : i32, i32
  }
  func.func @transform_19(%arg0: i32, %arg1: i32) -> (i32, i32) {
    %c0_i32 = arith.constant 0 : i32
    %c0_i32_0 = arith.constant 0 : i32
    %c0_i32_1 = arith.constant 0 : i32
    return %c0_i32, %c0_i32_0 : i32, i32
  }
  func.func @transform_20(%arg0: i32, %arg1: i32) -> (i32, i32) {
    %c0_i32 = arith.constant 0 : i32
    %c0_i32_0 = arith.constant 0 : i32
    %c0_i32_1 = arith.constant 0 : i32
    return %c0_i32, %c0_i32_0 : i32, i32
  }
  func.func @transform_21(%arg0: i32, %arg1: i32) -> (i32, i32) {
    %c0_i32 = arith.constant 0 : i32
    %c0_i32_0 = arith.constant 0 : i32
    %c0_i32_1 = arith.constant 0 : i32
    return %c0_i32, %c0_i32_0 : i32, i32
  }
  func.func @transform_22(%arg0: i32, %arg1: i32) -> (i32, i32, i32, i32) {
    %c0_i32 = arith.constant 0 : i32
    %c0_i32_0 = arith.constant 0 : i32
    %c0_i32_1 = arith.constant 0 : i32
    return %arg0, %arg1, %c0_i32, %c0_i32_0 : i32, i32, i32, i32
  }
  func.func @transform_23(%arg0: i32, %arg1: i32) -> (i32, i32, i32, i32) {
    %c0_i32 = arith.constant 0 : i32
    %c0_i32_0 = arith.constant 0 : i32
    %c0_i32_1 = arith.constant 0 : i32
    return %arg0, %arg1, %c0_i32, %c0_i32_0 : i32, i32, i32, i32
  }
}

</mosaic_0001>

<bundles_post_ra>
// kernel: decoder_forward.1
= control target key start
LH: loop header
LB: loop body
LE: loop exit
PB: predicated region body
PF: predicated region fallthrough
CT: control target
= control target key end

     0   :  { %s4377_s30 = smov 0   ;;  %s4379_s24 = smov 0   ;;  %s5358_s0 = inlined_call_operand.vmem [shape: bf16[2,8,8,128], index: 0, kind: input, shape index: {}]   ;;  %s5359_s1 = inlined_call_operand.vmem [shape: bf16[2,8,8,128], index: 1, kind: input, shape index: {}]   ;;  %s5360_s2 = inlined_call_operand.vmem [shape: bf16[2,8,8,64], index: 2, kind: input, shape index: {}]   ;;  %s5361_s3 = inlined_call_operand.vmem [shape: bf16[2,8,8,128], index: 3, kind: input, shape index: {}]   ;;  %s5362_s4 = inlined_call_operand.vmem [shape: bf16[256,384], index: 4, kind: input, shape index: {}]   ;;  %s5363_s5 = inlined_call_operand.vmem [shape: f32[1,64], index: 5, kind: input, shape index: {}]   ;;  %s5364_s6 = inlined_call_operand.vmem [shape: f32[1,64], index: 6, kind: input, shape index: {}]   ;;  %s5365_s7 = inlined_call_operand.vmem [shape: f32[1,64], index: 7, kind: input, shape index: {}]   ;;  %s5366_s8 = inlined_call_operand.vmem [shape: bf16[128,192], index: 8, kind: input, shape index: {}]   ;;  %s5367_s9 = inlined_call_operand.vmem [shape: f32[1,32], index: 9, kind: input, shape index: {}]   ;;  %s5368_s10 = inlined_call_operand.vmem [shape: f32[1,32], index: 10, kind: input, shape index: {}]   ;;  %s5369_s11 = inlined_call_operand.vmem [shape: f32[1,32], index: 11, kind: input, shape index: {}]   ;;  %s5370_s12 = inlined_call_operand.vmem [shape: bf16[64,192], index: 12, kind: input, shape index: {}]   ;;  %s5371_s13 = inlined_call_operand.vmem [shape: f32[1,32], index: 13, kind: input, shape index: {}]   ;;  %s5372_s14 = inlined_call_operand.vmem [shape: f32[1,32], index: 14, kind: input, shape index: {}]   ;;  %s5373_s15 = inlined_call_operand.vmem [shape: f32[1,32], index: 15, kind: input, shape index: {}]   ;;  %s5374_s16 = inlined_call_operand.vmem [shape: bf16[64,192], index: 16, kind: input, shape index: {}]   ;;  %s5375_s17 = inlined_call_operand.vmem [shape: f32[1,32], index: 17, kind: input, shape index: {}]   ;;  %s5376_s18 = inlined_call_operand.vmem [shape: f32[1,32], index: 18, kind: input, shape index: {}]   ;;  %s5377_s19 = inlined_call_operand.vmem [shape: f32[1,32], index: 19, kind: input, shape index: {}]   ;;  %s5378_s20 = inlined_call_operand.vmem [shape: bf16[64,320], index: 20, kind: input, shape index: {}]   ;;  %s5379_s21 = inlined_call_operand.vmem [shape: f32[1,128], index: 21, kind: input, shape index: {}]   ;;  %s5380_s22 = inlined_call_operand.vmem [shape: f32[2,8,8,128], index: 22, kind: output, shape index: {0}]   ;;  %s5381_s23 = inlined_call_operand.vmem [shape: f32[2,8,1,32], index: 23, kind: output, shape index: {1}]  }
   0x1   :  { %5387 = sst [smem:[#allocation13_spill]] %s5358_s0  ;;  %s4381_s25 = smov 0  }
   0x2   :  { %5388 = sst [smem:[#allocation14_spill]] %s5359_s1 }
   0x3   :  { %5389 = sst [smem:[#allocation15_spill]] %s5360_s2 }
   0x4   :  { %5390 = sst [smem:[#allocation16_spill]] %s5361_s3 }
   0x5   :  { %5391 = sst [smem:[#allocation17_spill]] %s5362_s4  ;;  %s4375_s4 = smov 0  }
   0x6   :  { %5392 = sst [smem:[#allocation18_spill]] %s5363_s5  ;;  %s4383_s5 = smov 0  }
   0x7   :  { %5393 = sst [smem:[#allocation19_spill]] %s5364_s6 }
   0x8   :  { %5394 = sst [smem:[#allocation20_spill]] %s5365_s7 }
   0x9   :  { %5395 = sst [smem:[#allocation21_spill]] %s5371_s13 }
   0xa   :  { %5396 = sst [smem:[#allocation22_spill]] %s5372_s14 }
   0xb   :  { %5397 = sst [smem:[#allocation23_spill]] %s5373_s15 }
   0xc   :  { %5398 = sst [smem:[#allocation24_spill]] %s5376_s18 }
   0xd   :  { %5399 = sst [smem:[#allocation25_spill]] %s5377_s19 }
   0xe   :  { %5400 = sst [smem:[#allocation26_spill]] %s5378_s20 }
   0xf   :  { %5401 = sst [smem:[#allocation27_spill]] %s5379_s21 }
  0x10 LB: > { %5402 = sst [smem:[#allocation8_spill]] %s4240_s24  ;;  %s43_s1 = sadd.s32 1, %s4240_s24  ;;  %s4248_s5 = sphi %s4383_s5, %s34_s5   ;;  %s4244_s25 = sphi %s4381_s25, %s5427_s25   ;;  %s4240_s24 = sphi %s4379_s24, %s5426_s24   ;;  %s4236_s30 = sphi %s4377_s30, %s5425_s30   ;;  %s4232_s4 = sphi %s4375_s4, %s5424_s4  }
  0x11   : > { %5403 = sst [smem:[#allocation9_spill]] %s4244_s25  ;;  %s46_s26 = sadd.s32 1, %s4244_s25 }
  0x12   : > { %5404 = sst [smem:[#allocation10_spill]] %s4248_s5  ;;  %p44_p0 = scmp.ge.s32.totalorder %s43_s1, 2 }
  0x13   : > { %p3729_p1 = scmp.ge.s32.totalorder %s4248_s5, 1  ;;  %p714_p2 = scmp.lt.s32.totalorder %s4248_s5, 5 }
  0x14   : > { %s5429_s1 = smov (%p44_p0, %s43_s1), 0  ;;  %s5431_s26 = smov (!%p44_p0, %s46_s26), %s4244_s25 }
  0x15   : > { %5405 = sst [smem:[#allocation11_spill]] %s5429_s1  ;;  %p715_p3 = pnand %p3729_p1, %p714_p2 }
  0x16   : > { %p48_p4 = scmp.ge.s32.totalorder %s5431_s26, 2  ;;  %s3730_s2 = sshll.u32 (!%p715_p3), %s4232_s4, 2 }
  0x17   : > { %718 = sbr.rel (%p715_p3) target bundleno = 2847 (0xb1f), region = 108  ;;  %p822_p5 = scmp.lt.s32.totalorder (!%p715_p3), %s4236_s30, 1 }
  0x18   : > { %s5433_s26 = smov (%p48_p4, %s5431_s26), 0  ;;  %p824_p6 = scmp.lt.s32.totalorder (!%p715_p3), %s3730_s2, 7 }
  0x19   : > { %5406 = sst [smem:[#allocation12_spill]] %s5433_s26  ;;  %p3747_p7 = scmp.ne.s32.totalorder (!%p715_p3), %s4232_s4, 0 }
  0x1a   : > { %s5407_s0 = sld [smem:[#allocation13_spill]] (!%p715_p3) }
  0x1b   : > { %s5408_s5 = sld [smem:[#allocation14_spill]] (!%p715_p3) }
  0x1c   : > { %s5435_s30 = smov (!%p822_p5, %s4236_s30), 1  ;;  %s5437_s2 = smov (!%p824_p6, %s3730_s2), 7 }
  0x1d   : > { %s3731_s6 = sshll.u32 %s5435_s30, 3  ;;  %s5409_s19 = sld [smem:[#allocation15_spill]] }
  0x1e   : > { %s827_s27 = sadd.s32 %s3731_s6, %s5437_s2  ;;  %s5410_s2 = sld [smem:[#allocation16_spill]] }
  0x1f   : > { %s3732_s7 = sshll.u32 %s827_s27, 2  ;;  %s3744_s28 = sshll.u32 %s827_s27, 3 }
  0x20   : > { %s4411_s1 = scalar_lea.vmem %s5407_s0, %s3732_s7  ;;  %s4431_s29 = scalar_lea.vmem %s5380_s22, %s3744_s28 }
  0x21   : > { %s4416_s26 = scalar_lea.vmem %s5408_s5, %s3732_s7  ;;  %s4436_s24 = scalar_lea.vmem %s5381_s23, %s827_s27 }
  0x22   : > { %884 = sbr.rel (%p3747_p7) target bundleno = 45 (0x2d), region = 112 }
  0x23   : > { %s4421_s18 = scalar_lea.vmem %s5409_s19, %s3732_s7 }
  0x24   : > { %s4426_s6 = scalar_lea.vmem %s5410_s2, %s3732_s7 }
  0x27   : > { %vm886_vm0 = vcmask 523264   ;;  %vm888_vm1 = vcmask 785408   ;;  %vm893_vm2 = vcmask 261120   ;;  %v4250_v0 = vmov 0.0  }
  0x28   : > { %885 = vst [vmem:[#allocation2] sm:$0xff] %v4250_v0  ;;  %892 = vst [vmem:[#allocation6] sm:$0xff] %v4250_v0 }
  0x29   : > { %895 = vst [vmem:[#allocation7] sm:$0xff] %v4250_v0  ;;  %887 = vst.msk [vmem:[#allocation2 + $0x8] sm:$0xff] %vm886_vm0, %v4250_v0 }
  0x2a   : > { %889 = vst.msk [vmem:[#allocation3] sm:$0xff] %vm888_vm1, %v4250_v0  ;;  %890 = vst.msk [vmem:[#allocation4] sm:$0xff] %vm888_vm1, %v4250_v0 }
  0x2b   : > { %891 = vst.msk [vmem:[#allocation5] sm:$0xff] %vm888_vm1, %v4250_v0 }
  0x2c   : > { %894 = vst.msk [vmem:[#allocation6 + $0x8] sm:$0xff] %vm893_vm2, %v4250_v0  ;;  %896 = vst.msk [vmem:[#allocation7 + $0x8] sm:$0xff] %vm893_vm2, %v4250_v0 }
  0x2d PF: > { %s5411_s15 = sld [smem:[#allocation17_spill]]  ;;  %v4251_v3 = vmov 0   ;;  %v4106_v19 = vld [vmem:[%s4411_s1] sm:$0xff]   ;;  %v4107_v29 = vld [vmem:[%s4411_s1 + $0x8] sm:$0xff]   ;;  %vm1484_vm3 = vcmask 523264   ;;  %vm1525_vm4 = vcmask 1046528  }
  0x2e   : > { %1152 = vmatprep.mubr.bf16.mxu0 %v4251_v3  ;;  %3963 = vmatprep.mubr.bf16.mxu1 %v4106_v19  ;;  %v4140_v38 = vld [vmem:[%s4416_s26] sm:$0xff]   ;;  %v4141_v53 = vld [vmem:[%s4416_s26 + $0x8] sm:$0xff]   ;;  %s4252_s26 = smov 64   ;;  %vm1558_vm5 = vcmask 1040384   ;;  %s5412_s21 = sld [smem:[#allocation18_spill]]  ;;  %vm1865_vm10 = vcmask 261120  }
  0x2f   : > { %s5413_s5 = sld [smem:[#allocation19_spill]]  ;;  %s4253_s30 = smov 32  }
  0x30   : > { %s5414_s28 = sld [smem:[#allocation20_spill]]  ;;  %s4254_s2 = smov 96  }
  0x31   : > { %s5415_s25 = sld [smem:[#allocation21_spill]] }
  0x32   : > { %s5416_s7 = sld [smem:[#allocation22_spill]] }
  0x33   : > { %v4074_v1 = vld [vmem:[%s5411_s15 + $0x16c] ss:$12 sps:$4 sm:$0xff]   ;;  %v4076_v2 = vld [vmem:[%s5411_s15 + $0x170] ss:$12 sps:$4 sm:$0xff]   ;;  %v4077_v4 = vld [vmem:[%s5411_s15 + $0x168] ss:$12 sps:$4 sm:$0xff]  }
  0x34   : > { %1120 = vmatprep.subr.bf16.mxu0 %v4074_v1  ;;  %3947 = vmatprep.subr.bf16.mxu1 %v4076_v2  ;;  %v4078_v5 = vld [vmem:[%s5411_s15 + $0x154] ss:$12 sps:$4 sm:$0xff]   ;;  %v4080_v6 = vld [vmem:[%s5411_s15 + $0x158] ss:$12 sps:$4 sm:$0xff]   ;;  %v4081_v7 = vld [vmem:[%s5411_s15 + $0x150] ss:$12 sps:$4 sm:$0xff]  }
  0x35   : > { %1121 = vmatpush1.bf16.msra.mxu0 %v4077_v4  ;;  %3948 = vmatpush3.bf16.msra.mxu1 %v4076_v2  ;;  %v4082_v8 = vld [vmem:[%s5411_s15 + $0x13c] ss:$12 sps:$4 sm:$0xff]   ;;  %v4084_v9 = vld [vmem:[%s5411_s15 + $0x140] ss:$12 sps:$4 sm:$0xff]   ;;  %v4085_v10 = vld [vmem:[%s5411_s15 + $0x138] ss:$12 sps:$4 sm:$0xff]  }
  0x36   : > { %1122 = vmatprep.subr.bf16.mxu0 %v4078_v5  ;;  %3949 = vmatprep.subr.bf16.mxu1 %v4080_v6  ;;  %v4086_v11 = vld [vmem:[%s5411_s15 + $0x124] ss:$12 sps:$4 sm:$0xff]   ;;  %v4088_v12 = vld [vmem:[%s5411_s15 + $0x128] ss:$12 sps:$4 sm:$0xff]   ;;  %v4089_v13 = vld [vmem:[%s5411_s15 + $0x120] ss:$12 sps:$4 sm:$0xff]  }
  0x37   : > { %v4090_v14 = vld [vmem:[%s5411_s15 + $0x10c] ss:$12 sps:$4 sm:$0xff]   ;;  %v4092_v15 = vld [vmem:[%s5411_s15 + $0x110] ss:$12 sps:$4 sm:$0xff]   ;;  %v4093_v16 = vld [vmem:[%s5411_s15 + $0x108] ss:$12 sps:$4 sm:$0xff]  }
  0x38   : > { %v4094_v17 = vld [vmem:[%s5411_s15 + $0xf4] ss:$12 sps:$4 sm:$0xff]   ;;  %v4096_v18 = vld [vmem:[%s5411_s15 + $0xf8] ss:$12 sps:$4 sm:$0xff]   ;;  %v4097_v20 = vld [vmem:[%s5411_s15 + $0xf0] ss:$12 sps:$4 sm:$0xff]  }
  0x39   : > { %1123 = vmatpush1.bf16.msra.mxu0 %v4081_v7  ;;  %3950 = vmatpush3.bf16.msra.mxu1 %v4080_v6  ;;  %v4098_v21 = vld [vmem:[%s5411_s15 + $0xdc] ss:$12 sps:$4 sm:$0xff]   ;;  %v4100_v22 = vld [vmem:[%s5411_s15 + $0xe0] ss:$12 sps:$4 sm:$0xff]   ;;  %v4101_v23 = vld [vmem:[%s5411_s15 + $0xd8] ss:$12 sps:$4 sm:$0xff]  }
  0x3a   : > { %1124 = vmatprep.subr.bf16.mxu0 %v4082_v8  ;;  %3951 = vmatprep.subr.bf16.mxu1 %v4084_v9  ;;  %v4102_v24 = vld [vmem:[%s5411_s15 + $0xc4] ss:$12 sps:$4 sm:$0xff]   ;;  %v4104_v25 = vld [vmem:[%s5411_s15 + $0xc8] ss:$12 sps:$4 sm:$0xff]   ;;  %v4105_v26 = vld [vmem:[%s5411_s15 + $0xc0] ss:$12 sps:$4 sm:$0xff]  }
  0x3b   : > { %v4110_v27 = vld [vmem:[%s5411_s15 + $0xac] ss:$12 sps:$4 sm:$0xff]   ;;  %v4111_v28 = vld [vmem:[%s5411_s15 + $0xb0] ss:$12 sps:$4 sm:$0xff]   ;;  %v4108_v30 = vld [vmem:[%s5411_s15 + $0xa8] ss:$12 sps:$4 sm:$0xff]  }
  0x3c   : > { %v4114_v31 = vld [vmem:[%s5411_s15 + $0x94] ss:$12 sps:$4 sm:$0xff]   ;;  %v4115_v32 = vld [vmem:[%s5411_s15 + $0x98] ss:$12 sps:$4 sm:$0xff]   ;;  %v4112_v33 = vld [vmem:[%s5411_s15 + $0x90] ss:$12 sps:$4 sm:$0xff]  }
  0x3d   : > { %1125 = vmatpush1.bf16.msra.mxu0 %v4085_v10  ;;  %3952 = vmatpush3.bf16.msra.mxu1 %v4084_v9  ;;  %v4118_v34 = vld [vmem:[%s5411_s15 + $0x7c] ss:$12 sps:$4 sm:$0xff]   ;;  %v4119_v35 = vld [vmem:[%s5411_s15 + $0x80] ss:$12 sps:$4 sm:$0xff]   ;;  %v4116_v36 = vld [vmem:[%s5411_s15 + $0x78] ss:$12 sps:$4 sm:$0xff]  }
  0x3e   : > { %1126 = vmatprep.subr.bf16.mxu0 %v4086_v11  ;;  %3953 = vmatprep.subr.bf16.mxu1 %v4088_v12  ;;  %v4122_v37 = vld [vmem:[%s5411_s15 + $0x64] ss:$12 sps:$4 sm:$0xff]   ;;  %v4123_v39 = vld [vmem:[%s5411_s15 + $0x68] ss:$12 sps:$4 sm:$0xff]   ;;  %v4120_v40 = vld [vmem:[%s5411_s15 + $0x60] ss:$12 sps:$4 sm:$0xff]  }
  0x3f   : > { %v4126_v41 = vld [vmem:[%s5411_s15 + $0x4c] ss:$12 sps:$4 sm:$0xff]   ;;  %v4127_v42 = vld [vmem:[%s5411_s15 + $0x50] ss:$12 sps:$4 sm:$0xff]   ;;  %v4124_v43 = vld [vmem:[%s5411_s15 + $0x48] ss:$12 sps:$4 sm:$0xff]  }
  0x40   : > { %v4130_v44 = vld [vmem:[%s5411_s15 + $0x34] ss:$12 sps:$4 sm:$0xff]   ;;  %v4131_v45 = vld [vmem:[%s5411_s15 + $0x38] ss:$12 sps:$4 sm:$0xff]   ;;  %v4128_v46 = vld [vmem:[%s5411_s15 + $0x30] ss:$12 sps:$4 sm:$0xff]  }
  0x41   : > { %1127 = vmatpush1.bf16.msra.mxu0 %v4089_v13  ;;  %3954 = vmatpush3.bf16.msra.mxu1 %v4088_v12  ;;  %v4134_v47 = vld [vmem:[%s5411_s15 + $0x1c] ss:$12 sps:$4 sm:$0xff]   ;;  %v4135_v48 = vld [vmem:[%s5411_s15 + $0x20] ss:$12 sps:$4 sm:$0xff]   ;;  %v4132_v49 = vld [vmem:[%s5411_s15 + $0x18] ss:$12 sps:$4 sm:$0xff]  }
  0x42   : > { %1128 = vmatprep.subr.bf16.mxu0 %v4090_v14  ;;  %3955 = vmatprep.subr.bf16.mxu1 %v4092_v15  ;;  %v4138_v50 = vld [vmem:[%s5411_s15 + $0x4] ss:$12 sps:$4 sm:$0xff]   ;;  %v4139_v51 = vld [vmem:[%s5411_s15 + $0x8] ss:$12 sps:$4 sm:$0xff]   ;;  %v4136_v52 = vld [vmem:[%s5411_s15] ss:$12 sps:$4 sm:$0xff]  }
  0x43   : > { %s5418_s13 = sld [smem:[#allocation24_spill]] }
  0x44   : > { %s5420_s4 = sld [smem:[#allocation26_spill]] }
  0x45   : > { %1129 = vmatpush1.bf16.msra.mxu0 %v4093_v16  ;;  %3956 = vmatpush3.bf16.msra.mxu1 %v4092_v15  ;;  %s5422_s14 = sld [smem:[#allocation27_spill]] }
  0x46   : > { %1130 = vmatprep.subr.bf16.mxu0 %v4094_v17  ;;  %3957 = vmatprep.subr.bf16.mxu1 %v4096_v18 }
  0x49   : > { %1131 = vmatpush1.bf16.msra.mxu0 %v4097_v20  ;;  %3958 = vmatpush3.bf16.msra.mxu1 %v4096_v18 }
  0x4a   : > { %1132 = vmatprep.subr.bf16.mxu0 %v4098_v21  ;;  %3959 = vmatprep.subr.bf16.mxu1 %v4100_v22  ;;  %s5421_s27 = smov %s5420_s4 }
  0x4d   : > { %1133 = vmatpush1.bf16.msra.mxu0 %v4101_v23  ;;  %3960 = vmatpush3.bf16.msra.mxu1 %v4100_v22  ;;  %v1464_v22 = vld [vmem:[#allocation2] sm:$0xff]  ;;  %v4142_v23 = vld [vmem:[%s5366_s8 + $0x30] ss:$8 sps:$4 sm:$0xff]  }
  0x4e   : > { %1134 = vmatprep.subr.bf16.mxu0 %v4102_v24  ;;  %3961 = vmatprep.subr.bf16.mxu1 %v4104_v25  ;;  %v4144_v24 = vld [vmem:[%s5366_s8 + $0x34] ss:$8 sps:$4 sm:$0xff]  }
  0x51   : > { %1135 = vmatpush1.bf16.msra.mxu0 %v4105_v26  ;;  %3962 = vmatpush3.bf16.msra.mxu1 %v4104_v25 }
  0x52   : > { %1362 = vmatprep.subr.bf16.mxu0 %v4110_v27  ;;  %3967 = vmatprep.subr.bf16.mxu1 %v4111_v28  ;;  %v4147_v27 = vld [vmem:[%s5366_s8 + $0x24] ss:$8 sps:$4 sm:$0xff]  }
  0x54   : > { %1153 = vmatmul.mubr.bf16.vlgmr.msra.gmra.mxu0 %v4106_v19  ;;  %3964 = vmatmul.mubr.bf16.vlgmr.msra.gmra.mxu1 %v4107_v29 }
  0x55   : > { %1363 = vmatpush1.bf16.msra.mxu0 %v4108_v30  ;;  %3968 = vmatpush3.bf16.msra.mxu1 %v4111_v28  ;;  %v4148_v28 = vld [vmem:[%s5366_s8 + $0x70] ss:$8 sps:$4 sm:$0xff]   ;;  %v4145_v30 = vld [vmem:[%s5366_s8 + $0x20] ss:$8 sps:$4 sm:$0xff]  }
  0x56   : > { %1364 = vmatprep.subr.bf16.mxu0 %v4114_v31  ;;  %3969 = vmatprep.subr.bf16.mxu1 %v4115_v32  ;;  %v4153_v31 = vld [vmem:[%s5366_s8 + $0x14] ss:$8 sps:$4 sm:$0xff]  }
  0x57   : > { %1162 = vmatprep.mubr.bf16.mxu0 %v4251_v3  ;;  %3983 = vmatprep.mubr.bf16.mxu1 %v4140_v38 }
  0x59   : > { %1365 = vmatpush1.bf16.msra.mxu0 %v4112_v33  ;;  %3970 = vmatpush3.bf16.msra.mxu1 %v4115_v32  ;;  %v4151_v32 = vld [vmem:[%s5366_s8 + $0x10] ss:$8 sps:$4 sm:$0xff]   ;;  %v4156_v33 = vld [vmem:[%s5366_s8 + $0x64] ss:$8 sps:$4 sm:$0xff]  }
  0x5a   : > { %1366 = vmatprep.subr.bf16.mxu0 %v4118_v34  ;;  %3971 = vmatprep.subr.bf16.mxu1 %v4119_v35  ;;  %v4154_v34 = vld [vmem:[%s5366_s8 + $0x60] ss:$8 sps:$4 sm:$0xff]  }
  0x5c   : > { %1163 = vmatmul.mubr.bf16.gmra.mxu0 %v4107_v29  ;;  %v4150_v29 = vld [vmem:[%s5366_s8 + $0x74] ss:$8 sps:$4 sm:$0xff]  }
  0x5d   : > { %1367 = vmatpush1.bf16.msra.mxu0 %v4116_v36  ;;  %3972 = vmatpush3.bf16.msra.mxu1 %v4119_v35  ;;  %v4159_v35 = vld [vmem:[%s5366_s8 + $0x4] ss:$8 sps:$4 sm:$0xff]   ;;  %v4157_v36 = vld [vmem:[%s5366_s8] ss:$8 sps:$4 sm:$0xff]  }
  0x5e   : > { %1368 = vmatprep.subr.bf16.mxu0 %v4122_v37  ;;  %3973 = vmatprep.subr.bf16.mxu1 %v4123_v39  ;;  %v4162_v37 = vld [vmem:[%s5366_s8 + $0x54] ss:$8 sps:$4 sm:$0xff]  }
  0x5f   : > { %1394 = vmatprep.mubr.bf16.mxu0 %v4251_v3 }
  0x61   : > { %1369 = vmatpush1.bf16.msra.mxu0 %v4120_v40  ;;  %3974 = vmatpush3.bf16.msra.mxu1 %v4123_v39  ;;  %v4163_v40 = vld [vmem:[%s4421_s18] sm:$0xff]  }
  0x62   : > { %1370 = vmatprep.subr.bf16.mxu0 %v4126_v41  ;;  %3975 = vmatprep.subr.bf16.mxu1 %v4127_v42  ;;  %v4166_v41 = vld [vmem:[%s5366_s8 + $0x44] ss:$8 sps:$4 sm:$0xff]  }
  0x65   : > { %1371 = vmatpush1.bf16.msra.mxu0 %v4124_v43  ;;  %3976 = vmatpush3.bf16.msra.mxu1 %v4127_v42  ;;  %v1465_v42 = vld [vmem:[#allocation2 + $0x8] sm:$0xff] }
  0x66   : > { %1372 = vmatprep.subr.bf16.mxu0 %v4130_v44  ;;  %3977 = vmatprep.subr.bf16.mxu1 %v4131_v45  ;;  %v4164_v43 = vld [vmem:[%s5366_s8 + $0x40] ss:$8 sps:$4 sm:$0xff]  }
  0x69   : > { %1373 = vmatpush1.bf16.msra.mxu0 %v4128_v46  ;;  %3978 = vmatpush3.bf16.msra.mxu1 %v4131_v45 }
  0x6a   : > { %1374 = vmatprep.subr.bf16.mxu0 %v4134_v47  ;;  %3979 = vmatprep.subr.bf16.mxu1 %v4135_v48 }
  0x6d   : > { %1375 = vmatpush1.bf16.msra.mxu0 %v4132_v49  ;;  %3980 = vmatpush3.bf16.msra.mxu1 %v4135_v48 }
  0x6e   : > { %1376 = vmatprep.subr.bf16.mxu0 %v4138_v50  ;;  %3981 = vmatprep.subr.bf16.mxu1 %v4139_v51 }
  0x71   : > { %1377 = vmatpush1.bf16.msra.mxu0 %v4136_v52  ;;  %3982 = vmatpush3.bf16.msra.mxu1 %v4139_v51 }
  0x72   : > { %1801 = vmatprep.subr.bf16.mxu1 %v4144_v24  ;;  %1692 = vmatprep.subr.bf16.mxu0 %v4150_v29 }
  0x74   : > { %1395 = vmatmul.mubr.bf16.vlgmr.msra.gmra.mxu0 %v4140_v38  ;;  %3984 = vmatmul.mubr.bf16.vlgmr.msra.gmra.mxu1 %v4141_v53  ;;  %v4160_v38 = vld [vmem:[%s5366_s8 + $0x50] ss:$8 sps:$4 sm:$0xff]  }
  0x75   : > { %1404 = vmatprep.mubr.bf16.mxu0 %v4251_v3  ;;  %1825 = vmatprep.mubr.bf16.mxu1 %v4251_v3 }
  0x76   : > { %1802 = vmatpush1.bf16.msra.mxu1 %v4142_v23  ;;  %1693 = vmatpush1.bf16.msra.mxu0 %v4148_v28 }
  0x77   : > { %1803 = vmatprep.subr.bf16.mxu1 %v4147_v27  ;;  %1694 = vmatprep.subr.bf16.mxu0 %v4156_v33 }
  0x7a   : > { %1804 = vmatpush1.bf16.msra.mxu1 %v4145_v30  ;;  %1695 = vmatpush1.bf16.msra.mxu0 %v4154_v34 }
  0x7b   : > { %1805 = vmatprep.subr.bf16.mxu1 %v4153_v31  ;;  %1696 = vmatprep.subr.bf16.mxu0 %v4162_v37 }
  0x7c   : > { %1405 = vmatmul.mubr.bf16.gmra.mxu0 %v4141_v53 }
  0x7d   : > { %1716 = vmatprep.mubr.bf16.mxu0 %v4251_v3 }
  0x7e   : > { %1806 = vmatpush1.bf16.msra.mxu1 %v4151_v32  ;;  %1697 = vmatpush1.bf16.msra.mxu0 %v4160_v38 }
  0x7f   : > { %1807 = vmatprep.subr.bf16.mxu1 %v4159_v35  ;;  %1698 = vmatprep.subr.bf16.mxu0 %v4166_v41 }
  0x82   : > { %1808 = vmatpush1.bf16.msra.mxu1 %v4157_v36  ;;  %1699 = vmatpush1.bf16.msra.mxu0 %v4164_v43 }
  0x85   : > { %3825 = vmatmul.mubr.msk.bf16.vlgmr.msra.gmra.mxu1 %vm1484_vm3, %v4163_v40 }
  0x86   : > { %1835 = vmatprep.mubr.bf16.mxu1 %v4251_v3 }
 0x114   : > { %v1154_v54 = vpop.f32.mrf.mxu0  ;;  %v3965_v58 = vpop.f32.mrf.mxu1 }
 0x116   : > { %v1156_v55 = vpop.f32.mrf.mxu0  ;;  %v1207_v60 = vpop.f32.mrf.mxu1 }
 0x118   : > { %v1158_v56 = vpop.f32.mrf.mxu0  ;;  %v3966_v62 = vpop.f32.mrf.mxu1 }
 0x11a   : > { %v1160_v57 = vpop.f32.mrf.mxu0  ;;  %v1210_v0 = vpop.f32.mrf.mxu1 }
 0x11c   : > { %v1164_v59 = vpop.f32.mrf.mxu0 }
 0x11e   : > { %v1166_v61 = vpop.f32.mrf.mxu0 }
 0x120   : > { %v4593_v63 = vpop.f32.mrf.mxu0 }
 0x122   : > { %v4595_v1 = vpop.f32.mrf.mxu0 }
 0x134   : > { %v1396_v2 = vpop.f32.mrf.mxu0  ;;  %v3985_v4 = vpop.f32.mrf.mxu1 }
 0x135   : > { %v1397_v19 = vadd.f32 %v1396_v2, %v1154_v54  ;;  %v1458_v26 = vadd.f32 %v3985_v4, %v3965_v58 }
 0x136   : > { %v1398_v5 = vpop.f32.mrf.mxu0  ;;  %v1449_v6 = vpop.f32.mrf.mxu1 }
 0x137   : > { %v4597_v7 = vadd.f32 %v1398_v5, %v1156_v55  ;;  %v1450_v13 = vadd.f32 %v1449_v6, %v1207_v60  ;;  %v1494_v25 = vadd.f32 %v1464_v22, %v1397_v19  ;;  %v3800_v5 = vld [vmem:[%s5412_s21] ss:$0 sm:$0xff] }
 0x138   : > { %v1400_v8 = vpop.f32.mrf.mxu0  ;;  %v3986_v9 = vpop.f32.mrf.mxu1 }
 0x139   : > { %v4599_v10 = vadd.f32 %v1400_v8, %v1158_v56  ;;  %v4601_v11 = vadd.f32 %v3986_v9, %v3966_v62  ;;  %1472 = vrot.lane.b32.xlu0 %v4597_v7, %s4252_s26  ;;  %v1495_v47 = vadd.f32 %v1465_v42, %v4597_v7  ;;  %v1517_v49 = vrot.slane %v1494_v25, 1  ;;  %v4167_v56 = vld [vmem:[%s4421_s18 + $0x8] sm:$0xff]   ;;  %s5419_s18 = sld [smem:[#allocation25_spill]] }
 0x13a   : > { %v1402_v12 = vpop.f32.mrf.mxu0  ;;  %v1452_v15 = vpop.f32.mrf.mxu1  ;;  %3826 = vmatmul.mubr.msk.bf16.gmra.mxu1 %vm1484_vm3, %v4167_v56 }
 0x13b   : > { %v4605_v14 = vadd.f32 %v1402_v12, %v1160_v57  ;;  %v1453_v20 = vadd.f32 %v1452_v15, %v1210_v0  ;;  %v1550_v54 = vrot.slane %v1495_v47, 7  ;;  %v1526_v60 = vsel %vm1525_vm4, %v1517_v49, 0.0  ;;  %2152 = vmatprep.mubr.bf16.mxu1 %v4251_v3 }
 0x13c   : > { %v1406_v16 = vpop.f32.mrf.mxu0 }
 0x13d   : > { %v4607_v17 = vadd.f32 %v1406_v16, %v1164_v59  ;;  %1476 = vrot.lane.b32.xlu1 %v4605_v14, %s4252_s26  ;;  %1474 = vrot.lane.b32.xlu0 %v1450_v13, %s4252_s26  ;;  %v1559_v0 = vsel %vm1558_vm5, 0.0, %v1550_v54  ;;  %v3801_v13 = vld [vmem:[%s5413_s5] ss:$0 sm:$0xff] }
 0x13e   : > { %v1408_v18 = vpop.f32.mrf.mxu0 }
 0x13f   : > { %v4612_v21 = vadd.f32 %v1408_v18, %v1166_v61 }
 0x140   : > { %v1410_v52 = vpop.f32.mrf.mxu0 }
 0x141   : > { %1478 = vrot.lane.b32.xlu1 %v1453_v20, %s4252_s26  ;;  %1480 = vrot.lane.b32.xlu0 %v4612_v21, %s4252_s26  ;;  %v1411_v57 = vadd.f32 %v1410_v52, %v4593_v63 }
 0x142   : > { %v1412_v7 = vpop.f32.mrf.mxu0 }
 0x143   : > { %v4691_v12 = vadd.f32 %v1412_v7, %v4595_v1  ;;  %v3802_v1 = vld [vmem:[%s5414_s28] ss:$0 sm:$0xff] }
 0x145   : > { %1482 = vrot.lane.b32.xlu1 %v1458_v26, %s4252_s26  ;;  %1530 = vrot.lane.b32.xlu0 %v1494_v25, %s4252_s26 }
 0x1ab   : > { %v1473_v39 = vpop.permute.xlu0 %1472 }
 0x1af   : > { %v1477_v44 = vpop.permute.xlu1 %1476  ;;  %v1475_v45 = vpop.permute.xlu0 %1474 }
 0x1b0   : > { %v1485_v46 = vsel %vm1484_vm3, %v1473_v39, %v1475_v45  ;;  %v1497_v63 = vadd.f32 %v1475_v45, %v4605_v14 }
 0x1b1   : > { %v1496_v48 = vadd.f32 %v1485_v46, %v4599_v10 }
 0x1b2   : > { %v1551_v8 = vrot.slane %v1497_v63, 7  ;;  %v1846_v63 = vld [vmem:[#allocation3] sm:$0xff] }
 0x1b3   : > { %v1479_v50 = vpop.permute.xlu1 %1478  ;;  %1532 = vrot.lane.b32.xlu1 %v1496_v48, %s4252_s26  ;;  %v1481_v51 = vpop.permute.xlu0 %1480  ;;  %v1518_v6 = vrot.slane %v1496_v48, 1 }
 0x1b4   : > { %v1486_v53 = vsel %vm1484_vm3, %v1477_v44, %v1479_v50  ;;  %v1499_v9 = vadd.f32 %v1479_v50, %v4612_v21  ;;  %v1560_v20 = vsel %vm1558_vm5, 0.0, %v1551_v8 }
 0x1b5   : > { %v1498_v55 = vadd.f32 %v1486_v53, %v4607_v17  ;;  %v1527_v14 = vsel %vm1525_vm4, %v1518_v6, 0.0 }
 0x1b6   : > { %v1552_v18 = vrot.slane %v1499_v9, 7  ;;  %v4168_v9 = vld [vmem:[%s5370_s12 + $0x30] ss:$8 sps:$4 sm:$0xff]  }
 0x1b7   : > { %v1483_v58 = vpop.permute.xlu1 %1482  ;;  %1534 = vrot.lane.b32.xlu0 %v1498_v55, %s4252_s26  ;;  %v1531_v59 = vpop.permute.xlu0 %1530  ;;  %v1519_v16 = vrot.slane %v1498_v55, 1 }
 0x1b8   : > { %v1487_v61 = vsel %vm1484_vm3, %v1481_v51, %v1483_v58  ;;  %v1542_v62 = vadd.f32 %v1531_v59, %v1526_v60  ;;  %v1501_v19 = vadd.f32 %v1483_v58, %v4691_v12  ;;  %v1561_v29 = vsel %vm1558_vm5, 0.0, %v1552_v18  ;;  %v1827_v51 = vpop.f32.mrf.mxu1 }
 0x1b9   : > { %v1500_v2 = vadd.f32 %v1487_v61, %v1411_v57  ;;  %v1528_v23 = vsel %vm1525_vm4, %v1519_v16, 0.0  ;;  %v4176_v16 = vld [vmem:[%s5370_s12 + $0x4] ss:$8 sps:$4 sm:$0xff]  }
 0x1ba   : > { %v1563_v4 = vadd.f32 %v1559_v0, %v1542_v62  ;;  %v1553_v28 = vrot.slane %v1501_v19, 7  ;;  %v1829_v52 = vpop.f32.mrf.mxu1  ;;  %v4737_v19 = vld [vmem:[%s4426_s6] sm:$0xff]  }
 0x1bb   : > { %1536 = vrot.lane.b32.xlu1 %v1500_v2, %s4252_s26  ;;  %v1520_v25 = vrot.slane %v1500_v2, 1 }
 0x1bc   : > { %v1573_v10 = vmul.f32 %v3800_v5, %v1563_v4  ;;  %v1562_v38 = vsel %vm1558_vm5, 0.0, %v1553_v28  ;;  %v1831_v53 = vpop.f32.mrf.mxu1 }
 0x1bd   : > { %v1529_v34 = vsel %vm1525_vm4, %v1520_v25, 0.0 }
 0x1be   : > { %v1583_v22 = vadd.f32 %v3801_v13, %v1573_v10  ;;  %v1833_v58 = vpop.f32.mrf.mxu1  ;;  %v4170_v10 = vld [vmem:[%s5370_s12 + $0x34] ss:$8 sps:$4 sm:$0xff]  }
 0x1bf   : > { %2043 = vmatprep.subr.bf16.mxu0 %v4170_v10 }
 0x1c0   : > { %v1597_v30 = vmul.f32 %v3802_v1, %v1583_v22  ;;  %vm1587_vm6 = vcmp.ge.f32.partialorder %v1583_v22, 0.0 }
 0x1c2   : > { %v1601_v39 = vsel %vm1587_vm6, %v1583_v22, %v1597_v30 }
 0x1fa   : > { %v1837_v61 = vpop.f32.mrf.mxu1 }
 0x225   : > { %v1533_v15 = vpop.permute.xlu1 %1532 }
 0x226   : > { %v1543_v17 = vadd.f32 %v1533_v15, %v1527_v14  ;;  %v4173_v15 = vld [vmem:[%s5370_s12 + $0x14] ss:$8 sps:$4 sm:$0xff]  }
 0x227   : > { %2132 = vmatprep.subr.bf16.mxu1 %v4173_v15 }
 0x228   : > { %v1564_v21 = vadd.f32 %v1560_v20, %v1543_v17  ;;  %v4174_v17 = vld [vmem:[%s5370_s12] ss:$8 sps:$4 sm:$0xff]  }
 0x229   : > { %v1535_v24 = vpop.permute.xlu0 %1534 }
 0x22a   : > { %v1574_v26 = vmul.f32 %v3800_v5, %v1564_v21  ;;  %v1544_v27 = vadd.f32 %v1535_v24, %v1528_v23  ;;  %v4179_v21 = vld [vmem:[%s5370_s12 + $0x24] ss:$8 sps:$4 sm:$0xff]   ;;  %v4177_v24 = vld [vmem:[%s5370_s12 + $0x20] ss:$8 sps:$4 sm:$0xff]  }
 0x22c   : > { %v1584_v31 = vadd.f32 %v3801_v13, %v1574_v26  ;;  %v1565_v32 = vadd.f32 %v1561_v29, %v1544_v27 }
 0x22d   : > { %v1537_v33 = vpop.permute.xlu1 %1536 }
 0x22e   : > { %vm1588_vm7 = vcmp.ge.f32.partialorder %v1584_v31, 0.0  ;;  %v1598_v35 = vmul.f32 %v3802_v1, %v1584_v31  ;;  %v1575_v36 = vmul.f32 %v3800_v5, %v1565_v32  ;;  %v1545_v37 = vadd.f32 %v1537_v33, %v1529_v34 }
 0x230   : > { %v1602_v40 = vsel %vm1588_vm7, %v1584_v31, %v1598_v35  ;;  %v1585_v41 = vadd.f32 %v3801_v13, %v1575_v36  ;;  %v1566_v42 = vadd.f32 %v1562_v38, %v1545_v37  ;;  %v4757_v35 = vld [vmem:[%s4426_s6 + $0x8] sm:$0xff]   ;;  %s5417_s6 = sld [smem:[#allocation23_spill]] }
 0x231   : > { %v3901_v43 = vpack.c.bf16 %v1602_v40, %v1601_v39 }
 0x232   : > { %v1576_v44 = vmul.f32 %v3800_v5, %v1566_v42  ;;  %v1599_v45 = vmul.f32 %v3802_v1, %v1585_v41  ;;  %vm1589_vm8 = vcmp.ge.f32.partialorder %v1585_v41, 0.0  ;;  %v1839_v5 = vpop.f32.mrf.mxu1 }
 0x233   : > { %3813 = vmatmul.mubr.msk.bf16.vlgmr.msra.gmra.mxu0 %vm1484_vm3, %v3901_v43 }
 0x234   : > { %v1586_v46 = vadd.f32 %v3801_v13, %v1576_v44  ;;  %1726 = vmatprep.mubr.bf16.mxu0 %v4251_v3  ;;  %v1603_v48 = vsel %vm1589_vm8, %v1585_v41, %v1599_v45  ;;  %v4171_v13 = vld [vmem:[%s5370_s12 + $0x10] ss:$8 sps:$4 sm:$0xff]   ;;  %2044 = vmatpush1.bf16.msra.mxu0 %v4168_v9  ;;  %v1841_v30 = vpop.f32.mrf.mxu1 }
 0x235   : > { %2133 = vmatpush1.bf16.msra.mxu1 %v4171_v13  ;;  %2045 = vmatprep.subr.bf16.mxu0 %v4179_v21 }
 0x236   : > { %v1600_v47 = vmul.f32 %v3802_v1, %v1586_v46  ;;  %vm1590_vm9 = vcmp.ge.f32.partialorder %v1586_v46, 0.0  ;;  %2134 = vmatprep.subr.bf16.mxu1 %v4176_v16 }
 0x238   : > { %v1604_v49 = vsel %vm1590_vm9, %v1586_v46, %v1600_v47  ;;  %2046 = vmatpush1.bf16.msra.mxu0 %v4177_v24  ;;  %v3827_v46 = vld [vmem:[%s5367_s9] ss:$0 sm:$0xff] }
 0x239   : > { %v3902_v50 = vpack.c.bf16 %v1604_v49, %v1603_v48  ;;  %2135 = vmatpush1.bf16.msra.mxu1 %v4174_v17 }
 0x23b   : > { %3814 = vmatmul.mubr.msk.bf16.gmra.mxu0 %vm1484_vm3, %v3902_v50  ;;  %v3828_v50 = vld [vmem:[%s5368_s10] ss:$0 sm:$0xff] }
 0x23c   : > { %2063 = vmatprep.mubr.bf16.mxu0 %v4251_v3  ;;  %3844 = vmatmul.mubr.msk.bf16.vlgmr.msra.gmra.mxu1 %vm1865_vm10, %v4737_v19 }
 0x23d   : > { %2162 = vmatprep.mubr.bf16.mxu1 %v4251_v3 }
 0x244   : > { %3845 = vmatmul.mubr.msk.bf16.gmra.mxu1 %vm1865_vm10, %v4757_v35 }
 0x245   : > { %2471 = vmatprep.mubr.bf16.mxu1 %v4251_v3 }
 0x2f3   : > { %v1718_v54 = vpop.f32.mrf.mxu0 }
 0x2f4   : > { %v1828_v55 = vadd.f32 %v1827_v51, %v1718_v54 }
 0x2f5   : > { %v1720_v56 = vpop.f32.mrf.mxu0 }
 0x2f6   : > { %v1830_v57 = vadd.f32 %v1829_v52, %v1720_v56  ;;  %1853 = vrot.lane.b32.xlu0 %v1828_v55, %s4253_s30  ;;  %v1872_v8 = vadd.f32 %v1846_v63, %v1828_v55 }
 0x2f7   : > { %v1722_v59 = vpop.f32.mrf.mxu0 }
 0x2f8   : > { %v1832_v60 = vadd.f32 %v1831_v53, %v1722_v59  ;;  %1855 = vrot.lane.b32.xlu1 %v1830_v57, %s4253_s30  ;;  %v1918_v14 = vrot.slane %v1872_v8, 7  ;;  %v1890_v40 = vrot.slane %v1872_v8, 1  ;;  %v3829_v59 = vld [vmem:[%s5369_s11] ss:$0 sm:$0xff] }
 0x2f9   : > { %v1724_v62 = vpop.f32.mrf.mxu0 }
 0x2fa   : > { %v1834_v0 = vadd.f32 %v1833_v58, %v1724_v62  ;;  %1857 = vrot.lane.b32.xlu0 %v1832_v60, %s4253_s30  ;;  %v1898_v42 = vsel %vm1525_vm4, %v1890_v40, 0.0 }
 0x2fb   : > { %v1728_v2 = vpop.f32.mrf.mxu0 }
 0x2fc   : > { %v1838_v4 = vadd.f32 %v1837_v61, %v1728_v2  ;;  %1859 = vrot.lane.b32.xlu1 %v1834_v0, %s4253_s30 }
 0x2fd   : > { %v1730_v6 = vpop.f32.mrf.mxu0 }
 0x2fe   : > { %v1840_v7 = vadd.f32 %v1839_v5, %v1730_v6  ;;  %1861 = vrot.lane.b32.xlu0 %v1838_v4, %s4253_s30 }
 0x2ff   : > { %v1732_v26 = vpop.f32.mrf.mxu0 }
 0x300   : > { %1863 = vrot.lane.b32.xlu1 %v1840_v7, %s4253_s30  ;;  %v4751_v31 = vadd.f32 %v1841_v30, %v1732_v26 }
 0x302   : > { %1902 = vrot.lane.b32.xlu0 %v1872_v8, %s4254_s2 }
 0x306   : > { %1922 = vrot.lane.b32.xlu0 %v1918_v14, %s4252_s26 }
 0x368   : > { %v1854_v18 = vpop.permute.xlu0 %1853 }
 0x36a   : > { %v1856_v20 = vpop.permute.xlu1 %1855 }
 0x36b   : > { %v1866_v22 = vsel %vm1865_vm10, %v1854_v18, %v1856_v20 }
 0x36c   : > { %v1873_v1 = vadd.f32 %v1866_v22, %v1832_v60  ;;  %v1858_v23 = vpop.permute.xlu0 %1857 }
 0x36e   : > { %v1860_v25 = vpop.permute.xlu1 %1859  ;;  %1904 = vrot.lane.b32.xlu1 %v1873_v1, %s4254_s2  ;;  %v1919_v29 = vrot.slane %v1873_v1, 7  ;;  %v1891_v47 = vrot.slane %v1873_v1, 1 }
 0x36f   : > { %v1867_v27 = vsel %vm1865_vm10, %v1858_v23, %v1860_v25 }
 0x370   : > { %v1874_v28 = vadd.f32 %v1867_v27, %v1838_v4  ;;  %v1862_v32 = vpop.permute.xlu0 %1861  ;;  %v1899_v51 = vsel %vm1525_vm4, %v1891_v47, 0.0  ;;  %v2173_v47 = vld [vmem:[#allocation4] sm:$0xff] }
 0x372   : > { %1906 = vrot.lane.b32.xlu0 %v1874_v28, %s4254_s2  ;;  %1924 = vrot.lane.b32.xlu1 %v1919_v29, %s4252_s26  ;;  %v1864_v33 = vpop.permute.xlu1 %1863  ;;  %v1920_v37 = vrot.slane %v1874_v28, 7  ;;  %v1892_v52 = vrot.slane %v1874_v28, 1  ;;  %v4787_v28 = vpop.f32.mrf.mxu1 }
 0x373   : > { %v1868_v34 = vsel %vm1865_vm10, %v1862_v32, %v1864_v33  ;;  %v4789_v32 = vpop.f32.mrf.mxu0 }
 0x374   : > { %v1875_v36 = vadd.f32 %v1868_v34, %v4751_v31  ;;  %v1903_v39 = vpop.permute.xlu0 %1902  ;;  %v1900_v60 = vsel %vm1525_vm4, %v1892_v52, 0.0  ;;  %v2154_v29 = vpop.f32.mrf.mxu1  ;;  %v4182_v52 = vld [vmem:[%s5374_s16 + $0x30] ss:$8 sps:$4 sm:$0xff]  }
 0x375   : > { %v1914_v44 = vadd.f32 %v1903_v39, %v1898_v42 }
 0x376   : > { %1926 = vrot.lane.b32.xlu0 %v1920_v37, %s4252_s26  ;;  %1908 = vrot.lane.b32.xlu1 %v1875_v36, %s4254_s2  ;;  %v1921_v38 = vrot.slane %v1875_v36, 7  ;;  %v1893_v61 = vrot.slane %v1875_v36, 1  ;;  %v2156_v30 = vpop.f32.mrf.mxu1 }
 0x378   : > { %v1923_v41 = vpop.permute.xlu0 %1922  ;;  %v1901_v8 = vsel %vm1525_vm4, %v1893_v61, 0.0  ;;  %v2158_v33 = vpop.f32.mrf.mxu1 }
 0x379   : > { %v1934_v43 = vsel %vm1558_vm5, 0.0, %v1923_v41 }
 0x37a   : > { %1928 = vrot.lane.b32.xlu1 %v1921_v38, %s4252_s26  ;;  %v1938_v45 = vadd.f32 %v1934_v43, %v1914_v44  ;;  %v2160_v39 = vpop.f32.mrf.mxu1 }
 0x37c   : > { %v1948_v49 = vmul.f32 %v3827_v46, %v1938_v45  ;;  %v2164_v42 = vpop.f32.mrf.mxu1 }
 0x37e   : > { %v1958_v57 = vadd.f32 %v3828_v50, %v1948_v49 }
 0x380   : > { %v1972_v5 = vmul.f32 %v3829_v59, %v1958_v57  ;;  %vm1962_vm11 = vcmp.ge.f32.partialorder %v1958_v57, 0.0 }
 0x382   : > { %v1976_v16 = vsel %vm1962_vm11, %v1958_v57, %v1972_v5  ;;  %v4193_v57 = vld [vmem:[%s5374_s16 + $0x4] ss:$8 sps:$4 sm:$0xff]  }
 0x3e0   : > { %v1905_v48 = vpop.permute.xlu1 %1904 }
 0x3e1   : > { %v1915_v53 = vadd.f32 %v1905_v48, %v1899_v51  ;;  %v2166_v48 = vpop.f32.mrf.mxu1 }
 0x3e4   : > { %v1907_v54 = vpop.permute.xlu0 %1906  ;;  %v1925_v55 = vpop.permute.xlu1 %1924 }
 0x3e5   : > { %v1935_v56 = vsel %vm1558_vm5, 0.0, %v1925_v55  ;;  %v1916_v62 = vadd.f32 %v1907_v54, %v1900_v60  ;;  %v4185_v54 = vld [vmem:[%s5374_s16 + $0x10] ss:$8 sps:$4 sm:$0xff]   ;;  %v4187_v55 = vld [vmem:[%s5374_s16 + $0x14] ss:$8 sps:$4 sm:$0xff]  }
 0x3e6   : > { %v1939_v58 = vadd.f32 %v1935_v56, %v1915_v53  ;;  %v4184_v53 = vld [vmem:[%s5374_s16 + $0x34] ss:$8 sps:$4 sm:$0xff]   ;;  %2451 = vmatprep.subr.bf16.mxu1 %v4187_v55 }
 0x3e7   : > { %2368 = vmatprep.subr.bf16.mxu0 %v4184_v53  ;;  %2452 = vmatpush1.bf16.msra.mxu1 %v4185_v54 }
 0x3e8   : > { %v1949_v0 = vmul.f32 %v3827_v46, %v1939_v58  ;;  %v1927_v2 = vpop.permute.xlu0 %1926  ;;  %v1909_v4 = vpop.permute.xlu1 %1908  ;;  %2453 = vmatprep.subr.bf16.mxu1 %v4193_v57 }
 0x3e9   : > { %v1936_v63 = vsel %vm1558_vm5, 0.0, %v1927_v2  ;;  %v1917_v13 = vadd.f32 %v1909_v4, %v1901_v8  ;;  %v4188_v4 = vld [vmem:[%s5374_s16 + $0x20] ss:$8 sps:$4 sm:$0xff]  }
 0x3ea   : > { %v1959_v6 = vadd.f32 %v3828_v50, %v1949_v0  ;;  %v1940_v7 = vadd.f32 %v1936_v63, %v1916_v62  ;;  %v4190_v62 = vld [vmem:[%s5374_s16 + $0x24] ss:$8 sps:$4 sm:$0xff]  }
 0x3ec   : > { %vm1963_vm12 = vcmp.ge.f32.partialorder %v1959_v6, 0.0  ;;  %v1973_v9 = vmul.f32 %v3829_v59, %v1959_v6  ;;  %v1950_v10 = vmul.f32 %v3827_v46, %v1940_v7  ;;  %v1929_v15 = vpop.permute.xlu1 %1928 }
 0x3ed   : > { %v1937_v14 = vsel %vm1558_vm5, 0.0, %v1929_v15 }
 0x3ee   : > { %v1977_v17 = vsel %vm1963_vm12, %v1959_v6, %v1973_v9  ;;  %v1960_v18 = vadd.f32 %v3828_v50, %v1950_v10  ;;  %v1941_v20 = vadd.f32 %v1937_v14, %v1917_v13  ;;  %v2168_v9 = vpop.f32.mrf.mxu1 }
 0x3ef   : > { %v3903_v22 = vpack.c.bf16 %v1977_v17, %v1976_v16 }
 0x3f0   : > { %v1951_v21 = vmul.f32 %v3827_v46, %v1941_v20  ;;  %v1974_v1 = vmul.f32 %v3829_v59, %v1960_v18  ;;  %vm1964_vm13 = vcmp.ge.f32.partialorder %v1960_v18, 0.0  ;;  %v4840_v20 = vld [vmem:[%s5375_s17] ss:$0 sm:$0xff] }
 0x3f1   : > { %3836 = vmatmul.mubr.msk.bf16.vlgmr.msra.gmra.mxu0 %vm1865_vm10, %v3903_v22 }
 0x3f2   : > { %v1961_v23 = vadd.f32 %v3828_v50, %v1951_v21  ;;  %2073 = vmatprep.mubr.bf16.mxu0 %v4251_v3  ;;  %v1978_v25 = vsel %vm1964_vm13, %v1960_v18, %v1974_v1  ;;  %2369 = vmatpush1.bf16.msra.mxu0 %v4182_v52 }
 0x3f3   : > { %2370 = vmatprep.subr.bf16.mxu0 %v4190_v62 }
 0x3f4   : > { %v1975_v24 = vmul.f32 %v3829_v59, %v1961_v23  ;;  %vm1965_vm14 = vcmp.ge.f32.partialorder %v1961_v23, 0.0  ;;  %v4191_v59 = vld [vmem:[%s5374_s16] ss:$8 sps:$4 sm:$0xff]  }
 0x3f5   : > { %2454 = vmatpush1.bf16.msra.mxu1 %v4191_v59 }
 0x3f6   : > { %v1979_v26 = vsel %vm1965_vm14, %v1961_v23, %v1975_v24  ;;  %2371 = vmatpush1.bf16.msra.mxu0 %v4188_v4 }
 0x3f7   : > { %v3904_v27 = vpack.c.bf16 %v1979_v26, %v1978_v25 }
 0x3f9   : > { %3837 = vmatmul.mubr.msk.bf16.gmra.mxu0 %vm1865_vm10, %v3904_v27  ;;  %v3846_v27 = vld [vmem:[%s5415_s25] ss:$0 sm:$0xff] }
 0x3fa   : > { %2388 = vmatprep.mubr.bf16.mxu0 %v4251_v3 }
 0x4b1   : > { %v2065_v34 = vpop.f32.mrf.mxu0 }
 0x4b2   : > { %v2155_v36 = vadd.f32 %v2154_v29, %v2065_v34  ;;  %v3847_v34 = vld [vmem:[%s5416_s7] ss:$0 sm:$0xff] }
 0x4b3   : > { %v2067_v37 = vpop.f32.mrf.mxu0 }
 0x4b4   : > { %v2157_v38 = vadd.f32 %v2156_v30, %v2067_v37  ;;  %2180 = vrot.lane.b32.xlu0 %v2155_v36, %s4253_s30  ;;  %v2198_v51 = vadd.f32 %v2173_v47, %v2155_v36 }
 0x4b5   : > { %v2069_v40 = vpop.f32.mrf.mxu0 }
 0x4b6   : > { %v2159_v41 = vadd.f32 %v2158_v33, %v2069_v40  ;;  %2182 = vrot.lane.b32.xlu1 %v2157_v38, %s4253_s30  ;;  %v2243_v56 = vrot.slane %v2198_v51, 7  ;;  %v2215_v21 = vrot.slane %v2198_v51, 1 }
 0x4b7   : > { %v2071_v43 = vpop.f32.mrf.mxu0 }
 0x4b8   : > { %v2161_v44 = vadd.f32 %v2160_v39, %v2071_v43  ;;  %2184 = vrot.lane.b32.xlu0 %v2159_v41, %s4253_s30  ;;  %v2223_v23 = vsel %vm1525_vm4, %v2215_v21, 0.0 }
 0x4b9   : > { %v2075_v45 = vpop.f32.mrf.mxu0 }
 0x4ba   : > { %v2165_v46 = vadd.f32 %v2164_v42, %v2075_v45  ;;  %2186 = vrot.lane.b32.xlu1 %v2161_v44, %s4253_s30  ;;  %v3848_v44 = vld [vmem:[%s5417_s6] ss:$0 sm:$0xff] }
 0x4bb   : > { %v2077_v49 = vpop.f32.mrf.mxu0 }
 0x4bc   : > { %v2167_v50 = vadd.f32 %v2166_v48, %v2077_v49  ;;  %2188 = vrot.lane.b32.xlu0 %v2165_v46, %s4253_s30 }
 0x4bd   : > { %v2079_v5 = vpop.f32.mrf.mxu0 }
 0x4be   : > { %2190 = vrot.lane.b32.xlu1 %v2167_v50, %s4253_s30  ;;  %v4826_v10 = vadd.f32 %v2168_v9, %v2079_v5 }
 0x4c0   : > { %2227 = vrot.lane.b32.xlu0 %v2198_v51, %s4254_s2 }
 0x4c4   : > { %2247 = vrot.lane.b32.xlu0 %v2243_v56, %s4252_s26 }
 0x526   : > { %v2181_v58 = vpop.permute.xlu0 %2180 }
 0x528   : > { %v2183_v60 = vpop.permute.xlu1 %2182 }
 0x529   : > { %v2192_v61 = vsel %vm1865_vm10, %v2181_v58, %v2183_v60 }
 0x52a   : > { %v2199_v0 = vadd.f32 %v2192_v61, %v2159_v41  ;;  %v2185_v2 = vpop.permute.xlu0 %2184 }
 0x52c   : > { %v2187_v63 = vpop.permute.xlu1 %2186  ;;  %2229 = vrot.lane.b32.xlu1 %v2199_v0, %s4254_s2  ;;  %v2244_v8 = vrot.slane %v2199_v0, 7  ;;  %v2216_v29 = vrot.slane %v2199_v0, 1 }
 0x52d   : > { %v2193_v6 = vsel %vm1865_vm10, %v2185_v2, %v2187_v63 }
 0x52e   : > { %v2200_v7 = vadd.f32 %v2193_v6, %v2165_v46  ;;  %v2189_v13 = vpop.permute.xlu0 %2188  ;;  %v2224_v36 = vsel %vm1525_vm4, %v2216_v29, 0.0 }
 0x530   : > { %2231 = vrot.lane.b32.xlu0 %v2200_v7, %s4254_s2  ;;  %2249 = vrot.lane.b32.xlu1 %v2244_v8, %s4252_s26  ;;  %v2191_v15 = vpop.permute.xlu1 %2190  ;;  %v2245_v17 = vrot.slane %v2200_v7, 7  ;;  %v2217_v37 = vrot.slane %v2200_v7, 1 }
 0x531   : > { %v2194_v14 = vsel %vm1865_vm10, %v2189_v13, %v2191_v15 }
 0x532   : > { %v2201_v16 = vadd.f32 %v2194_v14, %v4826_v10  ;;  %v2228_v22 = vpop.permute.xlu0 %2227  ;;  %v2225_v45 = vsel %vm1525_vm4, %v2217_v37, 0.0 }
 0x533   : > { %v2239_v25 = vadd.f32 %v2228_v22, %v2223_v23 }
 0x534   : > { %2251 = vrot.lane.b32.xlu0 %v2245_v17, %s4252_s26  ;;  %2233 = vrot.lane.b32.xlu1 %v2201_v16, %s4254_s2  ;;  %v2246_v18 = vrot.slane %v2201_v16, 7  ;;  %v2218_v46 = vrot.slane %v2201_v16, 1  ;;  %v4870_v16 = vpop.f32.mrf.mxu1 }
 0x536   : > { %v2248_v1 = vpop.permute.xlu0 %2247  ;;  %v2226_v55 = vsel %vm1525_vm4, %v2218_v46, 0.0 }
 0x537   : > { %v2259_v24 = vsel %vm1558_vm5, 0.0, %v2248_v1 }
 0x538   : > { %2409 = vrot.lane.b32.xlu0 %v4737_v19, %s4254_s2  ;;  %2253 = vrot.lane.b32.xlu1 %v2246_v18, %s4252_s26  ;;  %v2263_v26 = vadd.f32 %v2259_v24, %v2239_v25  ;;  %v4872_v18 = vpop.f32.mrf.mxu0 }
 0x53a   : > { %v2273_v33 = vmul.f32 %v3846_v27, %v2263_v26 }
 0x53c   : > { %2411 = vrot.lane.b32.xlu1 %v4757_v35, %s4254_s2  ;;  %2600 = vrot.lane.b32.xlu0 %v4840_v20, %s4253_s30  ;;  %v2283_v42 = vadd.f32 %v3847_v34, %v2273_v33 }
 0x53e   : > { %v2297_v52 = vmul.f32 %v3848_v44, %v2283_v42  ;;  %vm2287_vm15 = vcmp.ge.f32.partialorder %v2283_v42, 0.0 }
 0x540   : > { %v2301_v62 = vsel %vm2287_vm15, %v2283_v42, %v2297_v52  ;;  %vm1884_vm15 = vcmask 785408  }
 0x59e   : > { %v2230_v30 = vpop.permute.xlu1 %2229 }
 0x59f   : > { %v2240_v38 = vadd.f32 %v2230_v30, %v2224_v36 }
 0x5a2   : > { %v2232_v39 = vpop.permute.xlu0 %2231  ;;  %v2250_v40 = vpop.permute.xlu1 %2249 }
 0x5a3   : > { %v2260_v41 = vsel %vm1558_vm5, 0.0, %v2250_v40  ;;  %v2241_v47 = vadd.f32 %v2232_v39, %v2225_v45  ;;  %v2492_v45 = vld [vmem:[#allocation5] sm:$0xff] }
 0x5a4   : > { %v2264_v43 = vadd.f32 %v2260_v41, %v2240_v38  ;;  %v4883_v41 = vld [vmem:[%s5418_s13] ss:$0 sm:$0xff] }
 0x5a6   : > { %v2274_v48 = vmul.f32 %v3846_v27, %v2264_v43  ;;  %v2252_v49 = vpop.permute.xlu0 %2251  ;;  %v2234_v50 = vpop.permute.xlu1 %2233 }
 0x5a7   : > { %v2261_v51 = vsel %vm1558_vm5, 0.0, %v2252_v49  ;;  %v2242_v58 = vadd.f32 %v2234_v50, %v2226_v55 }
 0x5a8   : > { %v2284_v53 = vadd.f32 %v3847_v34, %v2274_v48  ;;  %v2265_v54 = vadd.f32 %v2261_v51, %v2241_v47 }
 0x5aa   : > { %vm2288_vm0 = vcmp.ge.f32.partialorder %v2284_v53, 0.0  ;;  %v2298_v56 = vmul.f32 %v3848_v44, %v2284_v53  ;;  %v2275_v57 = vmul.f32 %v3846_v27, %v2265_v54  ;;  %v2410_v59 = vpop.permute.xlu0 %2409  ;;  %v2254_v60 = vpop.permute.xlu1 %2253 }
 0x5ab   : > { %v2262_v61 = vsel %vm1558_vm5, 0.0, %v2254_v60  ;;  %3861 = vmatmul.mubr.msk.bf16.vlgmr.msra.gmra.mxu1 %vm1865_vm10, %v2410_v59 }
 0x5ac   : > { %v2302_v0 = vsel %vm2288_vm0, %v2284_v53, %v2298_v56  ;;  %v2285_v2 = vadd.f32 %v3847_v34, %v2275_v57  ;;  %v2266_v4 = vadd.f32 %v2262_v61, %v2242_v58  ;;  %2481 = vmatprep.mubr.bf16.mxu1 %v4251_v3 }
 0x5ad   : > { %v3905_v63 = vpack.c.bf16 %v2302_v0, %v2301_v62 }
 0x5ae   : > { %v2276_v5 = vmul.f32 %v3846_v27, %v2266_v4  ;;  %v2299_v6 = vmul.f32 %v3848_v44, %v2285_v2  ;;  %v2412_v8 = vpop.permute.xlu1 %2411  ;;  %vm2289_vm1 = vcmp.ge.f32.partialorder %v2285_v2, 0.0  ;;  %v2601_v42 = vpop.permute.xlu0 %2600 }
 0x5af   : > { %3855 = vmatmul.mubr.msk.bf16.vlgmr.msra.gmra.mxu0 %vm1865_vm10, %v3905_v63 }
 0x5b0   : > { %v2286_v7 = vadd.f32 %v3847_v34, %v2276_v5  ;;  %2398 = vmatprep.mubr.bf16.mxu0 %v4251_v3  ;;  %v2303_v13 = vsel %vm2289_vm1, %v2285_v2, %v2299_v6 }
 0x5b2   : > { %vm2290_vm2 = vcmp.ge.f32.partialorder %v2286_v7, 0.0  ;;  %v2300_v9 = vmul.f32 %v3848_v44, %v2286_v7 }
 0x5b3   : > { %3862 = vmatmul.mubr.msk.bf16.gmra.mxu1 %vm1865_vm10, %v2412_v8 }
 0x5b4   : > { %v2304_v15 = vsel %vm2290_vm2, %v2286_v7, %v2300_v9  ;;  %v4918_v7 = vld [vmem:[%s5419_s18] ss:$0 sm:$0xff] }
 0x5b5   : > { %v3906_v14 = vpack.c.bf16 %v2304_v15, %v2303_v13 }
 0x5b7   : > { %3856 = vmatmul.mubr.msk.bf16.gmra.mxu0 %vm1865_vm10, %v3906_v14 }
 0x5b8   : > { %2759 = vmatprep.mubr.bf16.mxu0 %v4251_v3 }
 0x66b   : > { %v2473_v17 = vpop.f32.mrf.mxu1 }
 0x66d   : > { %v2475_v22 = vpop.f32.mrf.mxu1 }
 0x66f   : > { %v2390_v21 = vpop.f32.mrf.mxu0  ;;  %v2477_v1 = vpop.f32.mrf.mxu1 }
 0x670   : > { %v2474_v23 = vadd.f32 %v2473_v17, %v2390_v21  ;;  %v4925_v17 = vld [vmem:[%s5420_s4 + $0x4c] ss:$12 sps:$4 sm:$0xff]  }
 0x671   : > { %v2392_v24 = vpop.f32.mrf.mxu0  ;;  %v2479_v25 = vpop.f32.mrf.mxu1  ;;  %2739 = vmatprep.subr.bf16.mxu0 %v4925_v17 }
 0x672   : > { %v2476_v26 = vadd.f32 %v2475_v22, %v2392_v24  ;;  %2499 = vrot.lane.b32.xlu0 %v2474_v23, %s4253_s30  ;;  %v4888_v50 = vadd.f32 %v2492_v45, %v2474_v23 }
 0x673   : > { %v2394_v27 = vpop.f32.mrf.mxu0  ;;  %v2483_v29 = vpop.f32.mrf.mxu1 }
 0x674   : > { %2501 = vrot.lane.b32.xlu1 %v2476_v26, %s4253_s30  ;;  %v2478_v33 = vadd.f32 %v2477_v1, %v2394_v27  ;;  %v2603_v59 = vmul.f32 %v2601_v42, %v4888_v50  ;;  %v4930_v1 = vld [vmem:[%s5421_s27 + $0x48] ss:$12 sps:$4 sm:$0xff]   ;;  %v2534_v26 = vrot.slane %v4888_v50, 7 }
 0x675   : > { %v2396_v30 = vpop.f32.mrf.mxu0  ;;  %v2485_v37 = vpop.f32.mrf.mxu1  ;;  %2740 = vmatpush1.bf16.msra.mxu0 %v4930_v1  ;;  %v4941_v27 = vld [vmem:[%s5421_s27 + $0x34] ss:$12 sps:$4 sm:$0xff]  }
 0x676   : > { %v2480_v34 = vadd.f32 %v2479_v25, %v2396_v30  ;;  %v4951_v30 = vld [vmem:[%s5421_s27 + $0x30] ss:$12 sps:$4 sm:$0xff]   ;;  %2741 = vmatprep.subr.bf16.mxu0 %v4941_v27 }
 0x677   : > { %v2400_v36 = vpop.f32.mrf.mxu0  ;;  %v2487_v51 = vpop.f32.mrf.mxu1 }
 0x678   : > { %2503 = vrot.lane.b32.xlu1 %v2478_v33, %s4253_s30  ;;  %2505 = vrot.lane.b32.xlu0 %v2480_v34, %s4253_s30  ;;  %v2484_v39 = vadd.f32 %v2483_v29, %v2400_v36  ;;  %v4946_v29 = vld [vmem:[%s5421_s27 + $0x50] ss:$12 sps:$4 sm:$0xff]   ;;  %v4964_v36 = vld [vmem:[%s5421_s27 + $0x38] ss:$12 sps:$4 sm:$0xff]  }
 0x679   : > { %v2402_v38 = vpop.f32.mrf.mxu0  ;;  %3987 = vmatprep.subr.bf16.mxu1 %v4946_v29  ;;  %2742 = vmatpush1.bf16.msra.mxu0 %v4951_v30 }
 0x67a   : > { %v2486_v40 = vadd.f32 %v2485_v37, %v2402_v38  ;;  %3988 = vmatpush3.bf16.msra.mxu1 %v4946_v29  ;;  %v4974_v38 = vld [vmem:[%s5421_s27 + $0x1c] ss:$12 sps:$4 sm:$0xff]  }
 0x67b   : > { %v2404_v49 = vpop.f32.mrf.mxu0  ;;  %3989 = vmatprep.subr.bf16.mxu1 %v4964_v36 }
 0x67c   : > { %2507 = vrot.lane.b32.xlu1 %v2484_v39, %s4253_s30  ;;  %2509 = vrot.lane.b32.xlu0 %v2486_v40, %s4253_s30  ;;  %v4892_v53 = vadd.f32 %v2487_v51, %v2404_v49 }
 0x67e   : > { %3990 = vmatpush3.bf16.msra.mxu1 %v4964_v36 }
 0x67f   : > { %2883 = vmatprep.subr.bf16.mxu1 %v4974_v38 }
 0x680   : > { %2607 = vrot.lane.b32.xlu1 %v4883_v41, %s4253_s30 }
 0x6e4   : > { %v2500_v43 = vpop.permute.xlu0 %2499 }
 0x6e6   : > { %v2502_v44 = vpop.permute.xlu1 %2501 }
 0x6e7   : > { %v2511_v46 = vsel %vm1865_vm10, %v2500_v43, %v2502_v44 }
 0x6e8   : > { %v4890_v52 = vadd.f32 %v2511_v46, %v2478_v33 }
 0x6ea   : > { %v2504_v47 = vpop.permute.xlu1 %2503  ;;  %v2506_v48 = vpop.permute.xlu0 %2505  ;;  %v2604_v61 = vmul.f32 %v2601_v42, %v4890_v52  ;;  %v2535_v34 = vrot.slane %v4890_v52, 7 }
 0x6eb   : > { %v2512_v54 = vsel %vm1865_vm10, %v2504_v47, %v2506_v48 }
 0x6ec   : > { %v4900_v60 = vadd.f32 %v2512_v54, %v2484_v39  ;;  %v4983_v39 = vld [vmem:[%s5421_s27 + $0x20] ss:$12 sps:$4 sm:$0xff]  }
 0x6ed   : > { %3995 = vmatprep.subr.bf16.mxu0 %v4983_v39 }
 0x6ee   : > { %v2508_v55 = vpop.permute.xlu1 %2507  ;;  %v2510_v56 = vpop.permute.xlu0 %2509  ;;  %v2605_v63 = vmul.f32 %v2601_v42, %v4900_v60  ;;  %v2536_v33 = vrot.slane %v4900_v60, 7 }
 0x6ef   : > { %v2513_v57 = vsel %vm1865_vm10, %v2508_v55, %v2510_v56 }
 0x6f0   : > { %v4897_v58 = vadd.f32 %v2513_v57, %v4892_v53 }
 0x6f2   : > { %v2608_v62 = vpop.permute.xlu1 %2607  ;;  %v2606_v4 = vmul.f32 %v2601_v42, %v4897_v58  ;;  %v2537_v37 = vrot.slane %v4897_v58, 7 }
 0x6f3   : > { %v2611_v0 = vadd.f32 %v2608_v62, %v2604_v61  ;;  %v2610_v2 = vadd.f32 %v2608_v62, %v2603_v59  ;;  %v4907_v5 = vadd.f32 %v2608_v62, %v2605_v63 }
 0x6f4   : > { %v4909_v6 = vadd.f32 %v2608_v62, %v2606_v4 }
 0x6f5   : > { %2624 = vrot.lane.b32.xlu1 %v2611_v0, %s4254_s2  ;;  %2622 = vrot.lane.b32.xlu0 %v2610_v2, %s4254_s2  ;;  %vm2614_vm6 = vcmp.ge.f32.partialorder %v2610_v2, 0.0  ;;  %vm2615_vm7 = vcmp.ge.f32.partialorder %v2611_v0, 0.0  ;;  %vm2616_vm8 = vcmp.ge.f32.partialorder %v4907_v5, 0.0 }
 0x6f6   : > { %vm2617_vm9 = vcmp.ge.f32.partialorder %v4909_v6, 0.0 }
 0x6f9   : > { %2626 = vrot.lane.b32.xlu0 %v4907_v5, %s4254_s2  ;;  %2628 = vrot.lane.b32.xlu1 %v4909_v6, %s4254_s2 }
 0x767   : > { %v2625_v8 = vpop.permute.xlu1 %2624  ;;  %v2623_v9 = vpop.permute.xlu0 %2622 }
 0x768   : > { %v2635_v13 = vmul.f32 %v4918_v7, %v2625_v8  ;;  %v2634_v15 = vmul.f32 %v4918_v7, %v2623_v9 }
 0x76a   : > { %v4064_v14 = vpack.i.bf16 %v2635_v13, %v2634_v15 }
 0x76b   : > { %v2627_v22 = vpop.permute.xlu0 %2626  ;;  %v2629_v21 = vpop.permute.xlu1 %2628 }
 0x76c   : > { %v2636_v23 = vmul.f32 %v4918_v7, %v2627_v22  ;;  %v2637_v24 = vmul.f32 %v4918_v7, %v2629_v21  ;;  %4065 = vrot.lane.b32.xlu0 %v4064_v14, %s4253_s30 }
 0x76e   : > { %v4069_v25 = vpack.i.bf16 %v2637_v24, %v2636_v23 }
 0x770   : > { %2538 = vrot.lane.b32.xlu0 %v2534_v26, %s4252_s26  ;;  %4070 = vrot.lane.b32.xlu1 %v4069_v25, %s4253_s30 }
 0x774   : > { %2542 = vrot.lane.b32.xlu0 %v2536_v33, %s4252_s26  ;;  %2540 = vrot.lane.b32.xlu1 %v2535_v34, %s4252_s26 }
 0x778   : > { %2544 = vrot.lane.b32.xlu1 %v2537_v37, %s4252_s26  ;;  %2829 = vrot.lane.b32.xlu0 %v4737_v19, %s4252_s26  ;;  %v4205_v37 = vld [vmem:[%s5421_s27] ss:$12 sps:$4 sm:$0xff]  }
 0x77c   : > { %2831 = vrot.lane.b32.xlu1 %v4757_v35, %s4252_s26 }
 0x7de   : > { %v4066_v40 = vpop.permute.xlu0 %4065 }
 0x7df   : > { %v4068_v42 = vunpack.i.h.bf16 %v4066_v40  ;;  %v4067_v43 = vunpack.i.l.bf16 %v4066_v40 }
 0x7e1   : > { %v2654_v44 = vsel %vm2614_vm6, %v2610_v2, %v4067_v43  ;;  %v2655_v45 = vsel %vm2615_vm7, %v2611_v0, %v4068_v42 }
 0x7e2   : > { %v2539_v46 = vpop.permute.xlu0 %2538  ;;  %v4071_v47 = vpop.permute.xlu1 %4070  ;;  %v3909_v48 = vpack.c.bf16 %v2655_v45, %v2654_v44 }
 0x7e3   : > { %v2550_v49 = vsel %vm1558_vm5, 0.0, %v2539_v46  ;;  %v4073_v51 = vunpack.i.h.bf16 %v4071_v47  ;;  %v4072_v54 = vunpack.i.l.bf16 %v4071_v47 }
 0x7e4   : > { %v2554_v55 = vadd.f32 %v2550_v49, %v4888_v50  ;;  %3031 = vrot.lane.b32.xlu0 %v3909_v48, %s4254_s2 }
 0x7e5   : > { %v2656_v56 = vsel %vm2616_vm8, %v4907_v5, %v4072_v54  ;;  %v2657_v57 = vsel %vm2617_vm9, %v4909_v6, %v4073_v51 }
 0x7e6   : > { %v2564_v59 = vmul.f32 %v4840_v20, %v2554_v55  ;;  %v2543_v61 = vpop.permute.xlu0 %2542  ;;  %v2541_v62 = vpop.permute.xlu1 %2540  ;;  %v3910_v0 = vpack.c.bf16 %v2657_v57, %v2656_v56 }
 0x7e7   : > { %v2552_v2 = vsel %vm1558_vm5, 0.0, %v2543_v61  ;;  %v2551_v4 = vsel %vm1558_vm5, 0.0, %v2541_v62 }
 0x7e8   : > { %v2574_v50 = vadd.f32 %v4883_v41, %v2564_v59  ;;  %v2556_v63 = vadd.f32 %v2552_v2, %v4900_v60  ;;  %v2555_v8 = vadd.f32 %v2551_v4, %v4890_v52  ;;  %3033 = vrot.lane.b32.xlu1 %v3910_v0, %s4254_s2  ;;  %3143 = vrot.lane.b32.xlu0 %v4737_v19, %s4253_s30 }
 0x7ea   : > { %v2566_v5 = vmul.f32 %v4840_v20, %v2556_v63  ;;  %v2565_v6 = vmul.f32 %v4840_v20, %v2555_v8  ;;  %v2545_v9 = vpop.permute.xlu1 %2544  ;;  %v2588_v15 = vmul.f32 %v4918_v7, %v2574_v50  ;;  %vm2578_vm11 = vcmp.ge.f32.partialorder %v2574_v50, 0.0  ;;  %v2830_v40 = vpop.permute.xlu0 %2829 }
 0x7eb   : > { %v2553_v13 = vsel %vm1558_vm5, 0.0, %v2545_v9 }
 0x7ec   : > { %v2575_v14 = vadd.f32 %v4883_v41, %v2565_v6  ;;  %v2557_v60 = vadd.f32 %v2553_v13, %v4897_v58  ;;  %3145 = vrot.lane.b32.xlu1 %v4757_v35, %s4253_s30  ;;  %v2576_v52 = vadd.f32 %v4883_v41, %v2566_v5  ;;  %v2592_v21 = vsel %vm2578_vm11, %v2574_v50, %v2588_v15  ;;  %v4209_v58 = vld [vmem:[%s5421_s27 + $0x8] ss:$12 sps:$4 sm:$0xff]  }
 0x7ee   : > { %vm2579_vm12 = vcmp.ge.f32.partialorder %v2575_v14, 0.0  ;;  %v2589_v19 = vmul.f32 %v4918_v7, %v2575_v14  ;;  %v2567_v22 = vmul.f32 %v4840_v20, %v2557_v60  ;;  %v2590_v24 = vmul.f32 %v4918_v7, %v2576_v52  ;;  %v2832_v42 = vpop.permute.xlu1 %2831 }
 0x7ef   : > { %vm2580_vm13 = vcmp.ge.f32.partialorder %v2576_v52, 0.0 }
 0x7f0   : > { %v2593_v23 = vsel %vm2579_vm12, %v2575_v14, %v2589_v19  ;;  %v2577_v26 = vadd.f32 %v4883_v41, %v2567_v22  ;;  %v2594_v20 = vsel %vm2580_vm13, %v2576_v52, %v2590_v24  ;;  %v4202_v41 = vld [vmem:[%s5421_s27 + $0x18] ss:$12 sps:$4 sm:$0xff]  }
 0x7f1   : > { %v3907_v25 = vpack.c.bf16 %v2593_v23, %v2592_v21 }
 0x7f2   : > { %vm2581_vm14 = vcmp.ge.f32.partialorder %v2577_v26, 0.0  ;;  %v2591_v35 = vmul.f32 %v4918_v7, %v2577_v26  ;;  %v4207_v7 = vld [vmem:[%s5421_s27 + $0x4] ss:$12 sps:$4 sm:$0xff]  }
 0x7f3   : > { %3874 = vmatmul.mubr.msk.bf16.vlgmr.msra.gmra.mxu0 %vm1865_vm10, %v3907_v25  ;;  %3991 = vmatprep.mubr.msk.bf16.mxu1 %vm1865_vm10, %v3907_v25 }
 0x7f4   : > { %2769 = vmatprep.mubr.bf16.mxu0 %v4251_v3  ;;  %3996 = vmatpush3.bf16.msra.mxu0 %v4983_v39  ;;  %v2595_v33 = vsel %vm2581_vm14, %v2577_v26, %v2591_v35 }
 0x7f5   : > { %3997 = vmatprep.subr.bf16.mxu0 %v4209_v58  ;;  %v3908_v34 = vpack.c.bf16 %v2595_v33, %v2594_v20 }
 0x7f7   : > { %3992 = vmatmul.mubr.msk.bf16.vlgmr.msra.gmra.mxu1 %vm1865_vm10, %v3908_v34 }
 0x7f8   : > { %3998 = vmatpush3.bf16.msra.mxu0 %v4209_v58  ;;  %2884 = vmatpush1.bf16.msra.mxu1 %v4202_v41 }
 0x7f9   : > { %2903 = vmatprep.mubr.bf16.mxu1 %v4251_v3  ;;  %2885 = vmatprep.subr.bf16.mxu1 %v4207_v7 }
 0x7fa   : > { %3053 = vmatprep.subr.bf16.mxu0 %v4925_v17 }
 0x7fb   : > { %3875 = vmatmul.mubr.msk.bf16.gmra.mxu0 %vm1865_vm10, %v3908_v34 }
 0x7fc   : > { %3999 = vmatprep.mubr.msk.bf16.mxu0 %vm1865_vm10, %v2830_v40  ;;  %2886 = vmatpush1.bf16.msra.mxu1 %v4205_v37 }
 0x7fd   : > { %4003 = vmatprep.subr.bf16.mxu1 %v4946_v29 }
 0x7ff   : > { %3884 = vmatmul.mubr.msk.bf16.vlgmr.msra.gmra.mxu1 %vm1865_vm10, %v2830_v40 }
 0x800   : > { %2913 = vmatprep.mubr.bf16.mxu1 %v4251_v3  ;;  %4004 = vmatpush3.bf16.msra.mxu1 %v4946_v29 }
 0x801   : > { %4005 = vmatprep.subr.bf16.mxu1 %v4964_v36 }
 0x803   : > { %4000 = vmatmul.mubr.msk.bf16.vlgmr.msra.gmra.mxu0 %vm1865_vm10, %v2832_v42 }
 0x804   : > { %3054 = vmatpush1.bf16.msra.mxu0 %v4930_v1  ;;  %3073 = vmatprep.mubr.bf16.mxu0 %v4251_v3 }
 0x805   : > { %3055 = vmatprep.subr.bf16.mxu0 %v4941_v27  ;;  %4006 = vmatpush3.bf16.msra.mxu1 %v4964_v36 }
 0x806   : > { %3165 = vmatprep.subr.bf16.mxu1 %v4974_v38 }
 0x807   : > { %3885 = vmatmul.mubr.msk.bf16.gmra.mxu1 %vm1865_vm10, %v2832_v42 }
 0x808   : > { %3056 = vmatpush1.bf16.msra.mxu0 %v4951_v30  ;;  %v5065_v30 = vpop.f32.mrf.mxu0 }
 0x809   : > { %4011 = vmatprep.subr.bf16.mxu0 %v4983_v39 }
 0x856   : > { %v3032_v17 = vpop.permute.xlu0 %3031 }
 0x857   : > { %3890 = vmatmul.mubr.msk.bf16.vlgmr.msra.gmra.mxu0 %vm1865_vm10, %v3032_v17  ;;  %4007 = vmatprep.mubr.msk.bf16.mxu1 %vm1865_vm10, %v3032_v17 }
 0x858   : > { %4012 = vmatpush3.bf16.msra.mxu0 %v4983_v39  ;;  %3083 = vmatprep.mubr.bf16.mxu0 %v4251_v3  ;;  %v5069_v39 = vpop.f32.mrf.mxu1 }
 0x859   : > { %4013 = vmatprep.subr.bf16.mxu0 %v4209_v58 }
 0x85a   : > { %v3034_v1 = vpop.permute.xlu1 %3033  ;;  %v3144_v27 = vpop.permute.xlu0 %3143 }
 0x85b   : > { %4008 = vmatmul.mubr.msk.bf16.vlgmr.msra.gmra.mxu1 %vm1865_vm10, %v3034_v1 }
 0x85c   : > { %3166 = vmatpush1.bf16.msra.mxu1 %v4202_v41  ;;  %4014 = vmatpush3.bf16.msra.mxu0 %v4209_v58 }
 0x85d   : > { %3167 = vmatprep.subr.bf16.mxu1 %v4207_v7  ;;  %3185 = vmatprep.mubr.bf16.mxu1 %v4251_v3 }
 0x85e   : > { %v3146_v29 = vpop.permute.xlu1 %3145 }
 0x85f   : > { %3891 = vmatmul.mubr.msk.bf16.gmra.mxu0 %vm1865_vm10, %v3034_v1 }
 0x860   : > { %3168 = vmatpush1.bf16.msra.mxu1 %v4205_v37  ;;  %4015 = vmatprep.mubr.msk.bf16.mxu0 %vm1865_vm10, %v3144_v27 }
 0x863   : > { %3894 = vmatmul.mubr.msk.bf16.vlgmr.msra.gmra.mxu1 %vm1865_vm10, %v3144_v27 }
 0x864   : > { %3195 = vmatprep.mubr.bf16.mxu1 %v4251_v3 }
 0x867   : > { %4016 = vmatmul.mubr.msk.bf16.vlgmr.msra.gmra.mxu0 %vm1865_vm10, %v3146_v29 }
 0x86b   : > { %3895 = vmatmul.mubr.msk.bf16.gmra.mxu1 %vm1865_vm10, %v3146_v29 }
 0x8b3   : > { %v2761_v36 = vpop.f32.mrf.mxu0 }
 0x8b5   : > { %v5067_v38 = vpop.f32.mrf.mxu0 }
 0x8b7   : > { %v2765_v43 = vpop.f32.mrf.mxu0  ;;  %v5071_v44 = vpop.f32.mrf.mxu1 }
 0x8b9   : > { %v5073_v45 = vpop.f32.mrf.mxu0  ;;  %v5075_v46 = vpop.f32.mrf.mxu1 }
 0x8bb   : > { %v2771_v47 = vpop.f32.mrf.mxu0  ;;  %v3994_v3 = vpop.f32.mrf.mxu1 }
 0x8bd   : > { %v5077_v48 = vpop.f32.mrf.mxu0  ;;  %v5079_v49 = vpop.f32.mrf.mxu1 }
 0x8bf   : > { %v2775_v51 = vpop.f32.mrf.mxu0  ;;  %v2905_v54 = vpop.f32.mrf.mxu1 }
 0x8c0   : > { %v5081_v55 = vadd.f32 %v2905_v54, %v2761_v36 }
 0x8c1   : > { %v5083_v56 = vpop.f32.mrf.mxu0  ;;  %v2907_v57 = vpop.f32.mrf.mxu1 }
 0x8c3   : > { %v5085_v59 = vpop.f32.mrf.mxu0  ;;  %v2909_v61 = vpop.f32.mrf.mxu1 }
 0x8c4   : > { %v5087_v62 = vadd.f32 %v2909_v61, %v2765_v43  ;;  %v5114_v61 = vadd.f32 %v2907_v57, %v5067_v38 }
 0x8c5   : > { %v2958_v0 = vpop.f32.mrf.mxu0  ;;  %v2911_v2 = vpop.f32.mrf.mxu1 }
 0x8c7   : > { %v4002_v4 = vpop.f32.mrf.mxu0  ;;  %v2915_v50 = vpop.f32.mrf.mxu1 }
 0x8c8   : > { %v5089_v63 = vadd.f32 %v4002_v4, %v3994_v3  ;;  %v5091_v8 = vadd.f32 %v2915_v50, %v2771_v47  ;;  %v5120_v50 = vadd.f32 %v2911_v2, %v5073_v45  ;;  %v2967_v45 = vadd.f32 %v5085_v59, %v5071_v44 }
 0x8c9   : > { %v2917_v5 = vpop.f32.mrf.mxu1  ;;  %v2961_v13 = vpop.f32.mrf.mxu0 }
 0x8ca   : > { %v5127_v38 = vadd.f32 %v2917_v5, %v5077_v48  ;;  %v2962_v57 = vadd.f32 %v2961_v13, %v5079_v49 }
 0x8cb   : > { %v2919_v6 = vpop.f32.mrf.mxu1 }
 0x8cc   : > { %v5093_v9 = vadd.f32 %v2919_v6, %v2775_v51  ;;  %v2959_v6 = vadd.f32 %v2958_v0, %v5075_v46 }
 0x8cd   : > { %v5095_v14 = vpop.f32.mrf.mxu1 }
 0x917   : > { %v3075_v15 = vpop.f32.mrf.mxu0 }
 0x919   : > { %v3077_v60 = vpop.f32.mrf.mxu0 }
 0x91b   : > { %v3079_v52 = vpop.f32.mrf.mxu0  ;;  %v4009_v19 = vpop.f32.mrf.mxu1 }
 0x91d   : > { %v3081_v22 = vpop.f32.mrf.mxu0  ;;  %v3128_v21 = vpop.f32.mrf.mxu1 }
 0x91f   : > { %v3085_v23 = vpop.f32.mrf.mxu0  ;;  %v4010_v24 = vpop.f32.mrf.mxu1 }
 0x921   : > { %v3087_v25 = vpop.f32.mrf.mxu0  ;;  %v3131_v26 = vpop.f32.mrf.mxu1 }
 0x923   : > { %v3089_v58 = vpop.f32.mrf.mxu0  ;;  %v3187_v35 = vpop.f32.mrf.mxu1 }
 0x925   : > { %v3091_v20 = vpop.f32.mrf.mxu0  ;;  %v3189_v33 = vpop.f32.mrf.mxu1 }
 0x926   : > { %v5097_v41 = vadd.f32 %v3189_v33, %v3077_v60  ;;  %v3188_v60 = vadd.f32 %v3187_v35, %v3075_v15 }
 0x927   : > { %v3191_v34 = vpop.f32.mrf.mxu1  ;;  %v4017_v7 = vpop.f32.mrf.mxu0 }
 0x928   : > { %v3192_v37 = vadd.f32 %v3191_v34, %v3079_v52  ;;  %3263 = vrot.lane.b32.xlu0 %v5097_v41, %s4254_s2  ;;  %v3249_v4 = vadd.f32 %v4017_v7, %v4009_v19  ;;  %v3255_v52 = vld [vmem:[#allocation7] sm:$0xff]  ;;  %v2973_v34 = vld [vmem:[#allocation6] sm:$0xff] }
 0x929   : > { %v3193_v40 = vpop.f32.mrf.mxu1  ;;  %v3240_v42 = vpop.f32.mrf.mxu0  ;;  %v5130_v19 = vadd.f32 %v3255_v52, %v3188_v60 }
 0x92a   : > { %v5101_v17 = vadd.f32 %v3193_v40, %v3081_v22  ;;  %v3241_v1 = vadd.f32 %v3240_v42, %v3128_v21  ;;  %v5159_v42 = vadd.f32 %v2973_v34, %v5081_v55 }
 0x92b   : > { %v3197_v27 = vpop.f32.mrf.mxu1  ;;  %v4018_v29 = vpop.f32.mrf.mxu0  ;;  %v3307_v46 = vrot.slane %v5130_v19, 7 }
 0x92c   : > { %v3198_v36 = vadd.f32 %v3197_v27, %v3085_v23  ;;  %v5103_v43 = vadd.f32 %v4018_v29, %v4010_v24  ;;  %3267 = vrot.lane.b32.xlu0 %v5101_v17, %s4254_s2  ;;  %3265 = vrot.lane.b32.xlu1 %v3241_v1, %s4254_s2 }
 0x92d   : > { %v3199_v47 = vpop.f32.mrf.mxu1  ;;  %v3243_v3 = vpop.f32.mrf.mxu0 }
 0x92e   : > { %v5108_v51 = vadd.f32 %v3199_v47, %v3087_v25  ;;  %v3244_v54 = vadd.f32 %v3243_v3, %v3131_v26 }
 0x92f   : > { %v3201_v0 = vpop.f32.mrf.mxu1 }
 0x930   : > { %3271 = vrot.lane.b32.xlu0 %v5108_v51, %s4254_s2  ;;  %3269 = vrot.lane.b32.xlu1 %v3244_v54, %s4254_s2  ;;  %v3202_v25 = vadd.f32 %v3201_v0, %v3089_v58 }
 0x931   : > { %v3203_v15 = vpop.f32.mrf.mxu1 }
 0x932   : > { %v5148_v24 = vadd.f32 %v3203_v15, %v3091_v20 }
 0x934   : > { %2981 = vrot.lane.b32.xlu0 %v5114_v61, %s4254_s2  ;;  %3273 = vrot.lane.b32.xlu1 %v3249_v4, %s4254_s2 }
 0x938   : > { %2985 = vrot.lane.b32.xlu0 %v5120_v50, %s4254_s2  ;;  %2983 = vrot.lane.b32.xlu1 %v2959_v6, %s4254_s2 }
 0x93c   : > { %2989 = vrot.lane.b32.xlu0 %v5127_v38, %s4254_s2  ;;  %2987 = vrot.lane.b32.xlu1 %v2962_v57, %s4254_s2 }
 0x940   : > { %3311 = vrot.lane.b32.xlu0 %v3307_v46, %s4253_s30  ;;  %2991 = vrot.lane.b32.xlu1 %v2967_v45, %s4254_s2  ;;  %v5207_v45 = vld [vmem:[%s5422_s14] ss:$0 sm:$0xff] }
 0x99a   : > { %v3264_v48 = vpop.permute.xlu0 %3263 }
 0x99e   : > { %v3268_v49 = vpop.permute.xlu0 %3267  ;;  %v3266_v2 = vpop.permute.xlu1 %3265 }
 0x99f   : > { %v3275_v5 = vsel %vm1884_vm15, %v3264_v48, %v3266_v2 }
 0x9a0   : > { %v5141_v13 = vadd.f32 %v3275_v5, %v3192_v37  ;;  %v3287_v5 = vadd.f32 %v3266_v2, %v5101_v17 }
 0x9a2   : > { %v3272_v22 = vpop.permute.xlu0 %3271  ;;  %v3270_v21 = vpop.permute.xlu1 %3269  ;;  %v3308_v44 = vrot.slane %v5141_v13, 7 }
 0x9a3   : > { %v3276_v59 = vsel %vm1884_vm15, %v3268_v49, %v3270_v21  ;;  %v3256_v49 = vld [vmem:[#allocation7 + $0x8] sm:$0xff] }
 0x9a4   : > { %v5145_v23 = vadd.f32 %v3276_v59, %v3198_v36  ;;  %3313 = vrot.lane.b32.xlu1 %v3308_v44, %s4253_s30  ;;  %v3372_v59 = vrot.slane %v3287_v5, 7 }
 0x9a6   : > { %v2982_v26 = vpop.permute.xlu0 %2981  ;;  %v3274_v35 = vpop.permute.xlu1 %3273  ;;  %v3309_v33 = vrot.slane %v5145_v23, 7 }
 0x9a7   : > { %v3277_v7 = vsel %vm1884_vm15, %v3272_v22, %v3274_v35  ;;  %v5153_v37 = vadd.f32 %v3274_v35, %v5148_v24  ;;  %v3285_v22 = vadd.f32 %v3256_v49, %v5097_v41  ;;  %v3289_v35 = vadd.f32 %v3270_v21, %v5108_v51 }
 0x9a8   : > { %v5155_v40 = vadd.f32 %v3277_v7, %v3202_v25  ;;  %3315 = vrot.lane.b32.xlu0 %v3309_v33, %s4253_s30  ;;  %v3380_v41 = vsel %vm1558_vm5, 0.0, %v3372_v59 }
 0x9a9   : > { %v3374_v17 = vrot.slane %v5153_v37, 7 }
 0x9aa   : > { %v2986_v20 = vpop.permute.xlu0 %2985  ;;  %v5161_v1 = vpop.permute.xlu1 %2983  ;;  %v3310_v58 = vrot.slane %v5155_v40, 7 }
 0x9ab   : > { %v2993_v27 = vsel %vm1884_vm15, %v2982_v26, %v5161_v1  ;;  %v3371_v26 = vrot.slane %v3285_v22, 7  ;;  %v3382_v37 = vsel %vm1558_vm5, 0.0, %v3374_v17 }
 0x9ac   : > { %3351 = vrot.lane.b32.xlu0 %v5159_v42, %s4252_s26  ;;  %3317 = vrot.lane.b32.xlu1 %v3310_v58, %s4253_s30  ;;  %v5170_v29 = vadd.f32 %v2993_v27, %v5087_v62  ;;  %v3373_v27 = vrot.slane %v3289_v35, 7 }
 0x9ad   : > { %v3379_v51 = vsel %vm1558_vm5, 0.0, %v3371_v26 }
 0x9ae   : > { %v2990_v36 = vpop.permute.xlu0 %2989  ;;  %v5172_v47 = vpop.permute.xlu1 %2987 }
 0x9af   : > { %v2994_v55 = vsel %vm1884_vm15, %v2986_v20, %v5172_v47 }
 0x9b0   : > { %v5177_v3 = vadd.f32 %v2994_v55, %v5091_v8  ;;  %3353 = vrot.lane.b32.xlu1 %v5170_v29, %s4252_s26  ;;  %v3381_v55 = vsel %vm1558_vm5, 0.0, %v3373_v27 }
 0x9b2   : > { %v3312_v54 = vpop.permute.xlu0 %3311  ;;  %3355 = vrot.lane.b32.xlu0 %v5177_v3, %s4252_s26  ;;  %v5183_v4 = vpop.permute.xlu1 %2991  ;;  %v3389_v49 = vrot.slane %v5177_v3, 1 }
 0x9b3   : > { %v2995_v62 = vsel %vm1884_vm15, %v2990_v36, %v5183_v4  ;;  %v3323_v60 = vsel %vm1558_vm5, 0.0, %v3312_v54 }
 0x9b4   : > { %v5188_v6 = vadd.f32 %v2995_v62, %v5093_v9  ;;  %v3388_v62 = vrot.slane %v5170_v29, 1 }
 0x9b6   : > { %3331 = vrot.lane.b32.xlu0 %v3323_v60, %s4253_s30  ;;  %3357 = vrot.lane.b32.xlu1 %v5188_v6, %s4252_s26 }
 0x9ba   : > { %3399 = vrot.lane.b32.xlu0 %v5130_v19, %s4252_s26  ;;  %3401 = vrot.lane.b32.xlu1 %v5141_v13, %s4252_s26 }
 0x9be   : > { %3403 = vrot.lane.b32.xlu0 %v5145_v23, %s4252_s26 }
 0xa16   : > { %v3314_v8 = vpop.permute.xlu1 %3313 }
 0xa17   : > { %v3324_v9 = vsel %vm1558_vm5, 0.0, %v3314_v8  ;;  %v3387_v8 = vrot.slane %v5159_v42, 1 }
 0xa18   : > { %3333 = vrot.lane.b32.xlu1 %v3324_v9, %s4253_s30 }
 0xa1a   : > { %v3316_v52 = vpop.permute.xlu0 %3315 }
 0xa1b   : > { %v3325_v57 = vsel %vm1558_vm5, 0.0, %v3316_v52  ;;  %v3396_v52 = vsel %vm1525_vm4, %v3388_v62, 0.0 }
 0xa1c   : > { %3335 = vrot.lane.b32.xlu0 %v3325_v57, %s4253_s30 }
 0xa1e   : > { %v3318_v46 = vpop.permute.xlu1 %3317  ;;  %v3352_v0 = vpop.permute.xlu0 %3351 }
 0xa1f   : > { %v3326_v48 = vsel %vm1558_vm5, 0.0, %v3318_v46  ;;  %v3363_v2 = vadd.f32 %v3352_v0, %v5130_v19  ;;  %v2974_v46 = vld [vmem:[#allocation6 + $0x8] sm:$0xff]  ;;  %v3395_v0 = vsel %vm1525_vm4, %v3387_v8, 0.0 }
 0xa20   : > { %3505 = vrot.lane.b32.xlu0 %v5207_v45, %s4254_s2  ;;  %3337 = vrot.lane.b32.xlu1 %v3326_v48, %s4253_s30  ;;  %v3005_v48 = vadd.f32 %v5161_v1, %v5120_v50  ;;  %v3003_v22 = vadd.f32 %v2974_v46, %v5114_v61  ;;  %v3007_v50 = vadd.f32 %v5172_v47, %v5127_v38 }
 0xa21   : > { %v1844_v61 = vadd.f32 %v4787_v28, %v4789_v32  ;;  %v2922_v38 = vadd.f32 %v5095_v14, %v5083_v56 }
 0xa22   : > { %v3354_v15 = vpop.permute.xlu1 %3353 }
 0xa23   : > { %v3364_v25 = vadd.f32 %v3354_v15, %v5141_v13 }
 0xa24   : > { %v3356_v44 = vpop.permute.xlu0 %3355  ;;  %3405 = vrot.lane.b32.xlu1 %v5155_v40, %s4252_s26 }
 0xa25   : > { %v3384_v20 = vadd.f32 %v3380_v41, %v3364_v25  ;;  %v3365_v21 = vadd.f32 %v3356_v44, %v5145_v23  ;;  %v3397_v44 = vsel %vm1525_vm4, %v3389_v49, 0.0 }
 0xa27   : > { %v3385_v54 = vadd.f32 %v3381_v55, %v3365_v21 }
 0xa28   : > { %v3332_v33 = vpop.permute.xlu0 %3331  ;;  %1504 = vrot.lane.b32.xlu1 %v4691_v12, %s4252_s26  ;;  %v3358_v34 = vpop.permute.xlu1 %3357  ;;  %v3383_v12 = vadd.f32 %v3379_v51, %v3363_v2 }
 0xa29   : > { %v3343_v7 = vadd.f32 %v3332_v33, %v5159_v42  ;;  %v3366_v58 = vadd.f32 %v3358_v34, %v5155_v40 }
 0xa2b   : > { %3423 = vrot.lane.b32.xlu0 %v3343_v7, %s4254_s2  ;;  %v3386_v36 = vadd.f32 %v3382_v37, %v3366_v58 }
 0xa2c   : > { %3441 = vrot.lane.b32.xlu1 %v3384_v20, %s4253_s30  ;;  %v3402_v60 = vpop.permute.xlu1 %3401  ;;  %v3400_v9 = vpop.permute.xlu0 %3399 }
 0xa2d   : > { %v3412_v57 = vadd.f32 %v3402_v60, %v3396_v52  ;;  %v3411_v5 = vadd.f32 %v3400_v9, %v3395_v0 }
 0xa2f   : > { %3439 = vrot.lane.b32.xlu0 %v3383_v12, %s4253_s30  ;;  %v3416_v42 = vadd.f32 %v3412_v57, %v3005_v48  ;;  %v3415_v59 = vadd.f32 %v3411_v5, %v3003_v22 }
 0xa30   : > { %3445 = vrot.lane.b32.xlu1 %v3386_v36, %s4253_s30  ;;  %v3404_v15 = vpop.permute.xlu0 %3403 }
 0xa33   : > { %3443 = vrot.lane.b32.xlu0 %v3385_v54, %s4253_s30 }
 0xa34   : > { %3457 = vrot.lane.b32.xlu1 %v3364_v25, %s4253_s30  ;;  %v3413_v25 = vadd.f32 %v3404_v15, %v3397_v44 }
 0xa36   : > { %v3417_v1 = vadd.f32 %v3413_v25, %v3007_v50 }
 0xa37   : > { %3455 = vrot.lane.b32.xlu0 %v3363_v2, %s4253_s30 }
 0xa38   : > { %3461 = vrot.lane.b32.xlu1 %v3366_v58, %s4253_s30 }
 0xa3b   : > { %3459 = vrot.lane.b32.xlu0 %v3365_v21, %s4253_s30 }
 0xa3c   : > { %3473 = vrot.lane.b32.xlu1 %v3416_v42, %s4254_s2 }
 0xa3f   : > { %3471 = vrot.lane.b32.xlu0 %v3415_v59, %s4254_s2 }
 0xa40   : > { %1878 = vrot.lane.b32.xlu1 %v4751_v31, %s4253_s30  ;;  %v2171_v31 = vadd.f32 %v4870_v16, %v4872_v18 }
 0xa43   : > { %3475 = vrot.lane.b32.xlu0 %v3417_v1, %s4254_s2 }
 0xa44   : > { %2204 = vrot.lane.b32.xlu1 %v4826_v10, %s4253_s30 }
 0xa47   : > { %1506 = vrot.lane.b32.xlu0 %v4601_v11, %s4252_s26  ;;  %v2490_v11 = vadd.f32 %v5069_v39, %v5065_v30 }
 0xa48   : > { %2523 = vrot.lane.b32.xlu1 %v4892_v53, %s4253_s30  ;;  %v3390_v53 = vrot.slane %v5188_v6, 1 }
 0xa4a   : > { %v3398_v39 = vsel %vm1525_vm4, %v3390_v53, 0.0  ;;  %vm3532_vm4 = vcmask 261127  }
 0xa4b   : > { %1880 = vrot.lane.b32.xlu0 %v1844_v61, %s4253_s30 }
 0xa4c   : > { %3012 = vrot.lane.b32.xlu1 %v2922_v38, %s4254_s2 }
 0xa4f   : > { %2206 = vrot.lane.b32.xlu0 %v2171_v31, %s4253_s30 }
 0xa50   : > { %3294 = vrot.lane.b32.xlu1 %v5148_v24, %s4254_s2 }
 0xa53   : > { %2525 = vrot.lane.b32.xlu0 %v2490_v11, %s4253_s30 }
 0xa57   : > { %3014 = vrot.lane.b32.xlu0 %v5089_v63, %s4254_s2  ;;  %v3009_v63 = vadd.f32 %v5183_v4, %v2922_v38 }
 0xa5b   : > { %3296 = vrot.lane.b32.xlu0 %v5103_v43, %s4254_s2 }
 0xa8a   : > { %v3334_v28 = vpop.permute.xlu1 %3333 }
 0xa8e   : > { %v3336_v32 = vpop.permute.xlu0 %3335 }
 0xa8f   : > { %v3345_v10 = vadd.f32 %v3336_v32, %v5177_v3  ;;  %v3344_v3 = vadd.f32 %v3334_v28, %v5170_v29 }
 0xa91   : > { %3427 = vrot.lane.b32.xlu0 %v3345_v10, %s4254_s2 }
 0xa92   : > { %v3506_v16 = vpop.permute.xlu0 %3505  ;;  %v3338_v18 = vpop.permute.xlu1 %3337 }
 0xa93   : > { %v3509_v30 = vadd.f32 %v3506_v16, %v5141_v13  ;;  %v3511_v14 = vadd.f32 %v3506_v16, %v5155_v40  ;;  %v3346_v35 = vadd.f32 %v3338_v18, %v5188_v6  ;;  %v3508_v40 = vadd.f32 %v3506_v16, %v5130_v19 }
 0xa94   : > { %v3510_v29 = vadd.f32 %v3506_v16, %v5145_v23 }
 0xa95   : > { %3522 = vrot.lane.b32.xlu0 %v3509_v30, %s4253_s30 }
 0xa96   : > { %v3406_v56 = vpop.permute.xlu1 %3405 }
 0xa97   : > { %v3414_v43 = vadd.f32 %v3406_v56, %v3398_v39 }
 0xa99   : > { %v3418_v24 = vadd.f32 %v3414_v43, %v3009_v63  ;;  %3526 = vrot.lane.b32.xlu0 %v3511_v14, %s4253_s30 }
 0xa9a   : > { %v1505_v47 = vpop.permute.xlu1 %1504 }
 0xa9b   : > { %3477 = vrot.lane.b32.xlu1 %v3418_v24, %s4254_s2 }
 0xa9d   : > { %v3424_v26 = vpop.permute.xlu0 %3423 }
 0xa9e   : > { %v5290_v13 = vpop.permute.xlu1 %3441 }
 0xa9f   : > { %3425 = vrot.lane.b32.xlu1 %v3344_v3, %s4254_s2 }
 0xaa1   : > { %v3440_v33 = vpop.permute.xlu0 %3439 }
 0xaa2   : > { %v5294_v4 = vpop.permute.xlu1 %3445  ;;  %v3483_v20 = vsel %vm1865_vm10, %v3424_v26, %v3440_v33 }
 0xaa3   : > { %3429 = vrot.lane.b32.xlu1 %v3346_v35, %s4254_s2 }
 0xaa5   : > { %v3444_v34 = vpop.permute.xlu0 %3443 }
 0xaa6   : > { %v3458_v17 = vpop.permute.xlu1 %3457 }
 0xaa7   : > { %3520 = vrot.lane.b32.xlu1 %v3508_v40, %s4253_s30 }
 0xaa9   : > { %v3456_v2 = vpop.permute.xlu0 %3455 }
 0xaaa   : > { %v3462_v41 = vpop.permute.xlu1 %3461  ;;  %v3487_v58 = vsel %vm1484_vm3, %v3483_v20, %v3456_v2 }
 0xaab   : > { %3524 = vrot.lane.b32.xlu1 %v3510_v29, %s4253_s30 }
 0xaad   : > { %v3460_v7 = vpop.permute.xlu0 %3459 }
 0xaae   : > { %v3474_v6 = vpop.permute.xlu1 %3473 }
 0xab1   : > { %v3472_v27 = vpop.permute.xlu0 %3471 }
 0xab2   : > { %v3491_v51 = vsel %vm1884_vm15, %v3487_v58, %v3472_v27  ;;  %v1879_v12 = vpop.permute.xlu1 %1878 }
 0xab3   : > { %v3501_v19 = vadd.f32 %v5207_v45, %v3491_v51 }
 0xab5   : > { %3512 = vst [vmem:[%s4431_s29] sm:$0xff] %v3501_v19  ;;  %v3476_v21 = vpop.permute.xlu0 %3475 }
 0xab6   : > { %v2205_v36 = vpop.permute.xlu1 %2204 }
 0xab9   : > { %v1507_v37 = vpop.permute.xlu0 %1506 }
 0xaba   : > { %v1508_v23 = vsel %vm1484_vm3, %v1505_v47, %v1507_v37  ;;  %1512 = vst.msk [vmem:[#allocation2 + $0x8] sm:$0xff] %vm1484_vm3, %v1507_v37  ;;  %v2524_v62 = vpop.permute.xlu1 %2523 }
 0xabb   : > { %1511 = vst [vmem:[#allocation2] sm:$0xff] %v1508_v23 }
 0xabd   : > { %v1881_v55 = vpop.permute.xlu0 %1880 }
 0xabe   : > { %v1882_v54 = vsel %vm1865_vm10, %v1879_v12, %v1881_v55  ;;  %v3013_v57 = vpop.permute.xlu1 %3012 }
 0xabf   : > { %1885 = vst.msk [vmem:[#allocation3] sm:$0xff] %vm1884_vm15, %v1882_v54 }
 0xac1   : > { %v2207_v60 = vpop.permute.xlu0 %2206 }
 0xac2   : > { %v2208_v8 = vsel %vm1865_vm10, %v2205_v36, %v2207_v60  ;;  %v3295_v0 = vpop.permute.xlu1 %3294 }
 0xac3   : > { %2210 = vst.msk [vmem:[#allocation4] sm:$0xff] %vm1884_vm15, %v2208_v8 }
 0xac5   : > { %v2526_v9 = vpop.permute.xlu0 %2525 }
 0xac6   : > { %v2527_v52 = vsel %vm1865_vm10, %v2524_v62, %v2526_v9 }
 0xac7   : > { %2529 = vst.msk [vmem:[#allocation5] sm:$0xff] %vm1884_vm15, %v2527_v52 }
 0xac9   : > { %v3015_v46 = vpop.permute.xlu0 %3014 }
 0xaca   : > { %v3016_v48 = vsel %vm1884_vm15, %v3013_v57, %v3015_v46  ;;  %3020 = vst.msk [vmem:[#allocation6 + $0x8] sm:$0xff] %vm1865_vm10, %v3015_v46 }
 0xacb   : > { %3019 = vst [vmem:[#allocation6] sm:$0xff] %v3016_v48 }
 0xacd   : > { %v3297_v49 = vpop.permute.xlu0 %3296 }
 0xace   : > { %v3298_v5 = vsel %vm1884_vm15, %v3295_v0, %v3297_v49  ;;  %3302 = vst.msk [vmem:[#allocation7 + $0x8] sm:$0xff] %vm1865_vm10, %v3297_v49 }
 0xacf   : > { %3301 = vst [vmem:[#allocation7] sm:$0xff] %v3298_v5 }
 0xb03   : > { %v3428_v42 = vpop.permute.xlu0 %3427 }
 0xb04   : > { %v3485_v15 = vsel %vm1865_vm10, %v3428_v42, %v3444_v34 }
 0xb05   : > { %v3489_v22 = vsel %vm1484_vm3, %v3485_v15, %v3460_v7 }
 0xb06   : > { %v3493_v44 = vsel %vm1884_vm15, %v3489_v22, %v3476_v21 }
 0xb07   : > { %v3503_v59 = vadd.f32 %v5207_v45, %v3493_v44  ;;  %v3523_v25 = vpop.permute.xlu0 %3522 }
 0xb08   : > { %3534 = vst.msk [vmem:[%s4436_s24 - $0x6] sm:$0x80] %vm3532_vm4, %v3523_v25 }
 0xb09   : > { %3514 = vst [vmem:[%s4431_s29 + $0x10] sm:$0xff] %v3503_v59 }
 0xb0b   : > { %v3527_v50 = vpop.permute.xlu0 %3526 }
 0xb0c   : > { %3536 = vst.msk [vmem:[%s4436_s24 - $0x4] sm:$0x80] %vm3532_vm4, %v3527_v50 }
 0xb0d   : > { %v3478_v1 = vpop.permute.xlu1 %3477 }
 0xb11   : > { %v3426_v61 = vpop.permute.xlu1 %3425 }
 0xb12   : > { %v3484_v38 = vsel %vm1865_vm10, %v3426_v61, %v5290_v13 }
 0xb13   : > { %v3488_v31 = vsel %vm1484_vm3, %v3484_v38, %v3458_v17 }
 0xb14   : > { %v3492_v11 = vsel %vm1884_vm15, %v3488_v31, %v3474_v6 }
 0xb15   : > { %v3502_v28 = vadd.f32 %v5207_v45, %v3492_v11  ;;  %v3430_v32 = vpop.permute.xlu1 %3429 }
 0xb16   : > { %v3486_v10 = vsel %vm1865_vm10, %v3430_v32, %v5294_v4 }
 0xb17   : > { %3513 = vst [vmem:[%s4431_s29 + $0x8] sm:$0xff] %v3502_v28  ;;  %v3490_v16 = vsel %vm1484_vm3, %v3486_v10, %v3462_v41 }
 0xb18   : > { %v3494_v18 = vsel %vm1884_vm15, %v3490_v16, %v3478_v1 }
 0xb19   : > { %v3504_v53 = vadd.f32 %v5207_v45, %v3494_v18  ;;  %v3521_v30 = vpop.permute.xlu1 %3520 }
 0xb1a   : > { %3533 = vst.msk [vmem:[%s4436_s24 - $0x7] sm:$0x80] %vm3532_vm4, %v3521_v30 }
 0xb1b   : > { %3515 = vst [vmem:[%s4431_s29 + $0x18] sm:$0xff] %v3504_v53 }
 0xb1d   : > { %v3525_v39 = vpop.permute.xlu1 %3524 }
 0xb1e   : > { %3535 = vst.msk [vmem:[%s4436_s24 - $0x5] sm:$0x80] %vm3532_vm4, %v3525_v39 }
 0xb1f PF: > { %s5423_s26 = sld [smem:[#allocation10_spill]] }
 0xb20   : > { %s5424_s4 = sld [smem:[#allocation8_spill]] }
 0xb21   : > { %s5425_s30 = sld [smem:[#allocation9_spill]] }
 0xb22   : > { %s5426_s24 = sld [smem:[#allocation11_spill]] }
 0xb23   : > { %s5427_s25 = sld [smem:[#allocation12_spill]] }
 0xb25   : > { %s34_s5 = sadd.s32 1, %s5423_s26  }
 0xb26   : > { %p31_p8 = scmp.ge.s32.totalorder %s34_s5, 6  }
 0xb28   :  { %33 = sbr.rel (!%p31_p8) target bundleno = 16 (0x10), region = 163 }

</bundles_post_ra>
